<compile_context>
chip_gen: v5e
topology: v5e:2x2
jax: 0.10.0
libtpu: 0.0.40
codegen_flags: <defaults>
</compile_context>

<pallas_src>
import functools

import numpy as np
import jax
import jax.numpy as jnp
from jax import lax
from jax.experimental import pallas as pl
from jax.experimental.pallas import tpu as pltpu

_EPS = 1e-5
_VMEM = pl.BlockSpec(memory_space=pltpu.MemorySpace.VMEM)


def _round_up(n, m):
    return ((n + m - 1) // m) * m


# ---------------------------------------------------------------------------
# Kernel body (single fused invocation, everything VMEM-resident, all 2-D ops)
# ---------------------------------------------------------------------------
def _branch(x_ref, r1_ref, c1m_ref, m1_ref, w1_ref, b1_ref, g4_ref, bt4_ref,
            g_ref, w2_ref, b2_ref, g8_ref, bt8_ref, n_taps):
    """One OOGAN branch. Returns channel-major (C_out, B*64)."""
    f32 = jnp.float32
    # ConvTranspose2d(cin, C1, 4, 1, 0) on a 1x1 map, as one matmul in
    # NHWC-flat layout (rows = (batch, 4x4 cell), cols = C1 channels).
    # xb[(b,q), (q',d)] = x[b,d] * [q == q']  via constant 0/1 matrices.
    xrep = jnp.dot(r1_ref[...], x_ref[...], preferred_element_type=f32)
    xb = jnp.dot(xrep, c1m_ref[...], preferred_element_type=f32) * m1_ref[...]
    h = jnp.dot(xb, w1_ref[...], preferred_element_type=f32) + b1_ref[...]
    # BatchNorm2d (training-mode batch stats) + LeakyReLU(0.01); channel = column.
    mu = jnp.mean(h, axis=0, keepdims=True)
    var = jnp.mean(jnp.square(h - mu), axis=0, keepdims=True)
    h = (h - mu) * lax.rsqrt(var + _EPS) * g4_ref[...] + bt4_ref[...]
    h = jnp.where(h > 0, h, 0.01 * h)
    # Channel-major relayout for the conv stage: (C1, B*16).
    hcm = h.T
    # Upscale2d(2) + pad-1 3x3 im2col via constant 0/1 gather matmuls.
    # taps rows are ordered (tap, channel) to match w2's packing.
    taps = jnp.concatenate(
        [jnp.dot(hcm, g_ref[t], preferred_element_type=f32)
         for t in range(n_taps)], axis=0)                      # (9*C1, B*64)
    # 3x3 conv as a single K = 9*C1 matmul, channel-major output (C2, B*64).
    y = jnp.dot(w2_ref[...], taps, preferred_element_type=f32) + b2_ref[...]
    # BatchNorm2d + LeakyReLU(0.1); channel = row.
    mu = jnp.mean(y, axis=1, keepdims=True)
    var = jnp.mean(jnp.square(y - mu), axis=1, keepdims=True)
    y = (y - mu) * lax.rsqrt(var + _EPS) * g8_ref[...] + bt8_ref[...]
    return jnp.where(y > 0, y, 0.1 * y)


def _oogan_cz_kernel(n_taps,
                     c_ref, z_ref, r1_ref, repbt_ref, g_ref,
                     c1m_c, m1_c, w1_c, b1_c, g4_c, bt4_c, w2_c, b2_c, g8_c, bt8_c,
                     c1m_z, m1_z, w1_z, b1_z, g4_z, bt4_z, w2_z, b2_z, g8_z, bt8_z,
                     wl1_ref, bl1_ref, wl2_ref, bl2_ref,
                     o_ref):
    f32 = jnp.float32
    cfeat = _branch(c_ref, r1_ref, c1m_c, m1_c, w1_c, b1_c, g4_c, bt4_c,
                    g_ref, w2_c, b2_c, g8_c, bt8_c, n_taps)
    zfeat = _branch(z_ref, r1_ref, c1m_z, m1_z, w1_z, b1_z, g4_z, bt4_z,
                    g_ref, w2_z, b2_z, g8_z, bt8_z, n_taps)
    # ChannelAttentionMask MLP (the `feat_8 *` scale is folded into wl2/bl2).
    a1 = jnp.dot(c_ref[...], wl1_ref[...], preferred_element_type=f32) + bl1_ref[...]
    a1 = jnp.maximum(a1, 0.0)
    a2 = jnp.dot(a1, wl2_ref[...], preferred_element_type=f32) + bl2_ref[...]
    # Broadcast the (B, C2) mask to channel-major (C2, B*64).
    attn = jnp.dot(repbt_ref[...], a2, preferred_element_type=f32).T
    o_ref[...] = attn * zfeat + cfeat


def _oogan_c_kernel(n_taps, c_ref, r1_ref, g_ref,
                    c1m_c, m1_c, w1_c, b1_c, g4_c, bt4_c, w2_c, b2_c, g8_c, bt8_c,
                    o_ref):
    o_ref[...] = _branch(c_ref, r1_ref, c1m_c, m1_c, w1_c, b1_c, g4_c, bt4_c,
                         g_ref, w2_c, b2_c, g8_c, bt8_c, n_taps)


# ---------------------------------------------------------------------------
# One-time parameter packing (hoisted out of the forward path)
# ---------------------------------------------------------------------------
def _upconv_gather(batch):
    """G[t, b*16+q, b*64+y*8+x] = 1 iff tap (dy,dx)=t of output pixel (y,x) of
    the pad-1 3x3 conv on the 2x-upsampled 4x4 map reads 4x4 cell q."""
    g = np.zeros((9, batch * 16, batch * 64), np.float32)
    for t in range(9):
        dy, dx = t // 3, t % 3
        for y in range(8):
            for x in range(8):
                v, u = y + dy - 1, x + dx - 1
                if 0 <= v < 8 and 0 <= u < 8:
                    q = (v // 2) * 4 + (u // 2)
                    for b in range(batch):
                        g[t, b * 16 + q, b * 64 + y * 8 + x] = 1.0
    return g


def _pack_branch(w_ct, b_ct, g4, bt4, w_c, b_c, g8, bt8):
    w_ct = np.asarray(w_ct, np.float32)
    w_c = np.asarray(w_c, np.float32)
    cin, c1 = w_ct.shape[0], w_ct.shape[1]
    c1p = max(8, _round_up(c1, 8))          # pad channels to a sublane multiple
    c2 = w_c.shape[0]
    # Stage-1 (ConvTranspose) weight: (16*cin, c1p), row = q*cin + d, q = i*4+j.
    w1 = np.transpose(w_ct, (2, 3, 0, 1)).reshape(16 * cin, c1)
    w1 = np.pad(w1, ((0, 0), (0, c1p - c1)))
    # 3x3 conv weight: (c2, 9*c1p), col = t*c1p + c, t = dy*3 + dx.
    w2 = np.transpose(w_c, (0, 2, 3, 1))                     # (c2, 3, 3, c1)
    w2 = np.pad(w2, ((0, 0), (0, 0), (0, 0), (0, c1p - c1))).reshape(c2, 9 * c1p)
    return {
        "c1m": np.tile(np.eye(cin, dtype=np.float32), (1, 16)),
        "w1": w1,
        "b1": np.pad(np.asarray(b_ct, np.float32), (0, c1p - c1))[None, :],
        "g4": np.pad(np.asarray(g4, np.float32), (0, c1p - c1),
                     constant_values=1.0)[None, :],
        "bt4": np.pad(np.asarray(bt4, np.float32), (0, c1p - c1))[None, :],
        "w2": w2,
        "b2": np.asarray(b_c, np.float32)[:, None],
        "g8": np.asarray(g8, np.float32)[:, None],
        "bt8": np.asarray(bt8, np.float32)[:, None],
    }


def pack_params(p, batch, c_dim, z_dim, feat_4, feat_8):
    """Repack PyTorch-layout params + build the constant gather matrices once."""
    def m1(cin):
        return np.kron(np.ones((batch, 1), np.float32),
                       np.kron(np.eye(16, dtype=np.float32),
                               np.ones((1, cin), np.float32)))

    packed = {
        "r1": np.kron(np.eye(batch, dtype=np.float32), np.ones((16, 1), np.float32)),
        "repbt": np.kron(np.eye(batch, dtype=np.float32), np.ones((64, 1), np.float32)),
        "g": _upconv_gather(batch),
    }
    bc = _pack_branch(p["w_ct4"], p["b_ct4"], p["g_bn4"], p["bt_bn4"],
                      p["w_c8"], p["b_c8"], p["g_bn8"], p["bt_bn8"])
    bc["m1"] = m1(c_dim)
    packed["c_branch"] = bc
    if z_dim > 0:
        bz = _pack_branch(p["w_ctz"], p["b_ctz"], p["g_bnz4"], p["bt_bnz4"],
                          p["w_z8"], p["b_z8"], p["g_bnz8"], p["bt_bnz8"])
        bz["m1"] = m1(z_dim)
        packed["z_branch"] = bz
        packed["wl1"] = np.asarray(p["w_l1"], np.float32).T
        packed["bl1"] = np.asarray(p["b_l1"], np.float32)[None, :]
        packed["wl2"] = feat_8 * np.asarray(p["w_l2"], np.float32).T
        packed["bl2"] = feat_8 * np.asarray(p["b_l2"], np.float32)[None, :]
    return jax.tree_util.tree_map(lambda a: jnp.asarray(a, jnp.float32), packed)


# ---------------------------------------------------------------------------
# Forward: one pallas_call + one tiny final transpose to NCHW
# ---------------------------------------------------------------------------
@jax.jit
def oogan_forward(c, z, packed):
    batch = c.shape[0]
    bc = packed["c_branch"]
    f8 = bc["w2"].shape[0]
    has_z = (z is not None) and ("z_branch" in packed)
    if has_z:
        bz = packed["z_branch"]
        args = (c, z, packed["r1"], packed["repbt"], packed["g"],
                bc["c1m"], bc["m1"], bc["w1"], bc["b1"], bc["g4"], bc["bt4"],
                bc["w2"], bc["b2"], bc["g8"], bc["bt8"],
                bz["c1m"], bz["m1"], bz["w1"], bz["b1"], bz["g4"], bz["bt4"],
                bz["w2"], bz["b2"], bz["g8"], bz["bt8"],
                packed["wl1"], packed["bl1"], packed["wl2"], packed["bl2"])
        kernel = functools.partial(_oogan_cz_kernel, 9)
    else:
        args = (c, packed["r1"], packed["g"],
                bc["c1m"], bc["m1"], bc["w1"], bc["b1"], bc["g4"], bc["bt4"],
                bc["w2"], bc["b2"], bc["g8"], bc["bt8"])
        kernel = functools.partial(_oogan_c_kernel, 9)
    out_cm = pl.pallas_call(
        kernel,
        out_shape=jax.ShapeDtypeStruct((f8, batch * 64), jnp.float32),
        in_specs=[_VMEM] * len(args),
        out_specs=_VMEM,
    )(*args)
    # Channel-major (C, B*8*8) -> PyTorch NCHW (B, C, 8, 8).
    return jnp.transpose(out_cm.reshape(f8, batch, 8, 8), (1, 0, 2, 3))


# ---------------------------------------------------------------------------
# Parameters (deterministic synthetic init, PyTorch weight layouts)
# ---------------------------------------------------------------------------
def init_params(key, c_dim, z_dim, feat_4, feat_8):
    ks = jax.random.split(key, 12)
    s = 0.1
    zh = max(z_dim // 2, 1)
    return {
        "w_ct4": jax.random.normal(ks[0], (c_dim, feat_4, 4, 4), jnp.float32) * s,
        "b_ct4": jax.random.normal(ks[1], (feat_4,), jnp.float32) * s,
        "g_bn4": jnp.ones((feat_4,), jnp.float32),
        "bt_bn4": jnp.zeros((feat_4,), jnp.float32),
        "w_c8": jax.random.normal(ks[2], (feat_8, feat_4, 3, 3), jnp.float32) * s,
        "b_c8": jax.random.normal(ks[3], (feat_8,), jnp.float32) * s,
        "g_bn8": jnp.ones((feat_8,), jnp.float32),
        "bt_bn8": jnp.zeros((feat_8,), jnp.float32),
        "w_l1": jax.random.normal(ks[4], (feat_8, c_dim), jnp.float32) * s,
        "b_l1": jax.random.normal(ks[5], (feat_8,), jnp.float32) * s,
        "w_l2": jax.random.normal(ks[6], (feat_8, feat_8), jnp.float32) * s,
        "b_l2": jax.random.normal(ks[7], (feat_8,), jnp.float32) * s,
        "w_ctz": jax.random.normal(ks[8], (z_dim, zh, 4, 4), jnp.float32) * s,
        "b_ctz": jax.random.normal(ks[9], (zh,), jnp.float32) * s,
        "g_bnz4": jnp.ones((zh,), jnp.float32),
        "bt_bnz4": jnp.zeros((zh,), jnp.float32),
        "w_z8": jax.random.normal(ks[10], (feat_8, zh, 3, 3), jnp.float32) * s,
        "b_z8": jax.random.normal(ks[11], (feat_8,), jnp.float32) * s,
        "g_bnz8": jnp.ones((feat_8,), jnp.float32),
        "bt_bnz8": jnp.zeros((feat_8,), jnp.float32),
        # TODO(synk): init_noise / instance_attention exist in __init__ but are
        # unused in forward(), so they are omitted here.
    }


# ---------------------------------------------------------------------------
# Pure-JAX reference (NCHW, mirrors PyTorch forward)
# ---------------------------------------------------------------------------
def ref_forward(c, z, p, feat_8, z_dim):
    def bn_lk(x, g, b, slope):
        mean = x.mean(axis=(0, 2, 3), keepdims=True)
        var = ((x - mean) ** 2).mean(axis=(0, 2, 3), keepdims=True)
        y = (x - mean) / jnp.sqrt(var + _EPS)
        y = y * g[None, :, None, None] + b[None, :, None, None]
        return jnp.where(y > 0, y, slope * y)

    def branch(x, w_ct, b_ct, g4, bt4, w_c, b_c, g8, bt8):
        h = jnp.einsum("bc,cfhw->bfhw", x, w_ct) + b_ct[None, :, None, None]
        h = bn_lk(h, g4, bt4, 0.01)
        up = jnp.repeat(jnp.repeat(h, 2, axis=2), 2, axis=3)
        y = lax.conv_general_dilated(up, w_c, (1, 1), "SAME",
                                     dimension_numbers=("NCHW", "OIHW", "NCHW"))
        y = y + b_c[None, :, None, None]
        return bn_lk(y, g8, bt8, 0.1)

    feat = branch(c, p["w_ct4"], p["b_ct4"], p["g_bn4"], p["bt_bn4"],
                  p["w_c8"], p["b_c8"], p["g_bn8"], p["bt_bn8"])
    if z_dim > 0 and z is not None:
        zfeat = branch(z, p["w_ctz"], p["b_ctz"], p["g_bnz4"], p["bt_bnz4"],
                       p["w_z8"], p["b_z8"], p["g_bnz8"], p["bt_bnz8"])
        a1 = jnp.maximum(c @ p["w_l1"].T + p["b_l1"], 0.0)
        a2 = a1 @ p["w_l2"].T + p["b_l2"]
        attn = feat_8 * a2
        feat = attn[:, :, None, None] * zfeat + feat
    return feat


# ---------------------------------------------------------------------------
if __name__ == "__main__":
    B, c_dim, z_dim, feat_4, feat_8 = 2, 8, 8, 16, 32

    key = jax.random.PRNGKey(0)
    kc, kz, kp = jax.random.split(key, 3)
    c = jax.random.normal(kc, (B, c_dim), jnp.float32)
    z = jax.random.normal(kz, (B, z_dim), jnp.float32)
    params = init_params(kp, c_dim, z_dim, feat_4, feat_8)
    packed = pack_params(params, B, c_dim, z_dim, feat_4, feat_8)

    out = jax.block_until_ready(oogan_forward(c, z, packed))
    assert out.shape == (B, feat_8, 8, 8), out.shape

    ref = ref_forward(c, z, params, feat_8, z_dim)
    err = float(jnp.max(jnp.abs(out - ref)))
    # Both kernel and reference use default MXU matmul precision; tolerance is
    # tight enough to catch any layout/packing bug (those are O(1) errors).
    assert jnp.allclose(out, ref, atol=3e-2, rtol=3e-2), err

    # z=None path (c-branch only).
    out_c = jax.block_until_ready(oogan_forward(c, None, packed))
    ref_c = ref_forward(c, None, params, feat_8, z_dim)
    err_c = float(jnp.max(jnp.abs(out_c - ref_c)))
    assert jnp.allclose(out_c, ref_c, atol=3e-2, rtol=3e-2), err_c

    print("KERNEL_OK")
</pallas_src>

<mosaic_0001>
module attributes {stable_mosaic.version = 11 : i64} {
  func.func @_oogan_cz_kernel(%arg0: memref<2x8xf32, #tpu.memory_space<vmem>>, %arg1: memref<2x8xf32, #tpu.memory_space<vmem>>, %arg2: memref<32x2xf32, #tpu.memory_space<vmem>>, %arg3: memref<128x2xf32, #tpu.memory_space<vmem>>, %arg4: memref<9x32x128xf32, #tpu.memory_space<vmem>>, %arg5: memref<8x128xf32, #tpu.memory_space<vmem>>, %arg6: memref<32x128xf32, #tpu.memory_space<vmem>>, %arg7: memref<128x16xf32, #tpu.memory_space<vmem>>, %arg8: memref<1x16xf32, #tpu.memory_space<vmem>>, %arg9: memref<1x16xf32, #tpu.memory_space<vmem>>, %arg10: memref<1x16xf32, #tpu.memory_space<vmem>>, %arg11: memref<32x144xf32, #tpu.memory_space<vmem>>, %arg12: memref<32x1xf32, #tpu.memory_space<vmem>>, %arg13: memref<32x1xf32, #tpu.memory_space<vmem>>, %arg14: memref<32x1xf32, #tpu.memory_space<vmem>>, %arg15: memref<8x128xf32, #tpu.memory_space<vmem>>, %arg16: memref<32x128xf32, #tpu.memory_space<vmem>>, %arg17: memref<128x8xf32, #tpu.memory_space<vmem>>, %arg18: memref<1x8xf32, #tpu.memory_space<vmem>>, %arg19: memref<1x8xf32, #tpu.memory_space<vmem>>, %arg20: memref<1x8xf32, #tpu.memory_space<vmem>>, %arg21: memref<32x72xf32, #tpu.memory_space<vmem>>, %arg22: memref<32x1xf32, #tpu.memory_space<vmem>>, %arg23: memref<32x1xf32, #tpu.memory_space<vmem>>, %arg24: memref<32x1xf32, #tpu.memory_space<vmem>>, %arg25: memref<8x32xf32, #tpu.memory_space<vmem>>, %arg26: memref<1x32xf32, #tpu.memory_space<vmem>>, %arg27: memref<32x32xf32, #tpu.memory_space<vmem>>, %arg28: memref<1x32xf32, #tpu.memory_space<vmem>>, %arg29: memref<32x128xf32, #tpu.memory_space<vmem>>) attributes {dimension_semantics = [], scalar_prefetch = 0 : i64, scratch_operands = 0 : i64, tpu.core_type = #tpu.core_type<tc>} {
    %c0 = arith.constant 0 : index
    %c0_0 = arith.constant 0 : index
    %0 = vector.load %arg2[%c0, %c0_0] : memref<32x2xf32, #tpu.memory_space<vmem>>, vector<32x2xf32>
    %c0_1 = arith.constant 0 : index
    %c0_2 = arith.constant 0 : index
    %1 = vector.load %arg0[%c0_1, %c0_2] : memref<2x8xf32, #tpu.memory_space<vmem>>, vector<2x8xf32>
    %cst = arith.constant dense<0.000000e+00> : vector<32x8xf32>
    %2 = tpu.matmul %0, %1, %cst {dimension_numbers = #tpu.dot_dimension_numbers<[1], [0], [0], [1], [0, 0, 1, 1], [], []>} : vector<32x2xf32>, vector<2x8xf32>, vector<32x8xf32> -> vector<32x8xf32>
    %c0_3 = arith.constant 0 : index
    %c0_4 = arith.constant 0 : index
    %3 = vector.load %arg5[%c0_3, %c0_4] : memref<8x128xf32, #tpu.memory_space<vmem>>, vector<8x128xf32>
    %cst_5 = arith.constant dense<0.000000e+00> : vector<32x128xf32>
    %4 = tpu.matmul %2, %3, %cst_5 {dimension_numbers = #tpu.dot_dimension_numbers<[1], [0], [0], [1], [0, 0, 1, 1], [], []>} : vector<32x8xf32>, vector<8x128xf32>, vector<32x128xf32> -> vector<32x128xf32>
    %c0_6 = arith.constant 0 : index
    %c0_7 = arith.constant 0 : index
    %5 = vector.load %arg6[%c0_6, %c0_7] : memref<32x128xf32, #tpu.memory_space<vmem>>, vector<32x128xf32>
    %6 = arith.mulf %4, %5 : vector<32x128xf32>
    %c0_8 = arith.constant 0 : index
    %c0_9 = arith.constant 0 : index
    %7 = vector.load %arg7[%c0_8, %c0_9] : memref<128x16xf32, #tpu.memory_space<vmem>>, vector<128x16xf32>
    %cst_10 = arith.constant dense<0.000000e+00> : vector<32x16xf32>
    %8 = tpu.matmul %6, %7, %cst_10 {dimension_numbers = #tpu.dot_dimension_numbers<[1], [0], [0], [1], [0, 0, 1, 1], [], []>} : vector<32x128xf32>, vector<128x16xf32>, vector<32x16xf32> -> vector<32x16xf32>
    %c0_11 = arith.constant 0 : index
    %c0_12 = arith.constant 0 : index
    %9 = vector.load %arg8[%c0_11, %c0_12] : memref<1x16xf32, #tpu.memory_space<vmem>>, vector<1x16xf32>
    %10 = vector.broadcast %9 : vector<1x16xf32> to vector<32x16xf32>
    %11 = arith.addf %8, %10 : vector<32x16xf32>
    %cst_13 = arith.constant dense<0.000000e+00> : vector<16xf32>
    %12 = vector.multi_reduction <add>, %11, %cst_13 [0] : vector<32x16xf32> to vector<16xf32>
    %13 = vector.shape_cast %12 : vector<16xf32> to vector<1x16xf32>
    %cst_14 = arith.constant 3.200000e+01 : f32
    %14 = vector.broadcast %cst_14 : f32 to vector<1x16xf32>
    %15 = arith.divf %13, %14 : vector<1x16xf32>
    %16 = vector.broadcast %15 : vector<1x16xf32> to vector<32x16xf32>
    %17 = arith.subf %11, %16 : vector<32x16xf32>
    %18 = arith.mulf %17, %17 : vector<32x16xf32>
    %cst_15 = arith.constant dense<0.000000e+00> : vector<16xf32>
    %19 = vector.multi_reduction <add>, %18, %cst_15 [0] : vector<32x16xf32> to vector<16xf32>
    %20 = vector.shape_cast %19 : vector<16xf32> to vector<1x16xf32>
    %cst_16 = arith.constant 3.200000e+01 : f32
    %21 = vector.broadcast %cst_16 : f32 to vector<1x16xf32>
    %22 = arith.divf %20, %21 : vector<1x16xf32>
    %23 = vector.broadcast %15 : vector<1x16xf32> to vector<32x16xf32>
    %24 = arith.subf %11, %23 : vector<32x16xf32>
    %cst_17 = arith.constant 9.99999974E-6 : f32
    %25 = vector.broadcast %cst_17 : f32 to vector<1x16xf32>
    %26 = arith.addf %22, %25 : vector<1x16xf32>
    %27 = math.rsqrt %26 : vector<1x16xf32>
    %28 = vector.broadcast %27 : vector<1x16xf32> to vector<32x16xf32>
    %29 = arith.mulf %24, %28 : vector<32x16xf32>
    %c0_18 = arith.constant 0 : index
    %c0_19 = arith.constant 0 : index
    %30 = vector.load %arg9[%c0_18, %c0_19] : memref<1x16xf32, #tpu.memory_space<vmem>>, vector<1x16xf32>
    %31 = vector.broadcast %30 : vector<1x16xf32> to vector<32x16xf32>
    %32 = arith.mulf %29, %31 : vector<32x16xf32>
    %c0_20 = arith.constant 0 : index
    %c0_21 = arith.constant 0 : index
    %33 = vector.load %arg10[%c0_20, %c0_21] : memref<1x16xf32, #tpu.memory_space<vmem>>, vector<1x16xf32>
    %34 = vector.broadcast %33 : vector<1x16xf32> to vector<32x16xf32>
    %35 = arith.addf %32, %34 : vector<32x16xf32>
    %cst_22 = arith.constant 0.000000e+00 : f32
    %36 = vector.broadcast %cst_22 : f32 to vector<32x16xf32>
    %37 = arith.cmpf ogt, %35, %36 : vector<32x16xf32>
    %cst_23 = arith.constant 0.00999999977 : f32
    %38 = vector.broadcast %cst_23 : f32 to vector<32x16xf32>
    %39 = arith.mulf %38, %35 : vector<32x16xf32>
    %40 = arith.select %37, %35, %39 : vector<32x16xi1>, vector<32x16xf32>
    %41 = tpu.transpose %40, [1, 0] : vector<32x16xf32> -> vector<16x32xf32>
    %c0_24 = arith.constant 0 : index
    %c0_25 = arith.constant 0 : index
    %c0_26 = arith.constant 0 : index
    %42 = vector.load %arg4[%c0_24, %c0_25, %c0_26] : memref<9x32x128xf32, #tpu.memory_space<vmem>>, vector<1x32x128xf32>
    %43 = vector.shape_cast %42 : vector<1x32x128xf32> to vector<32x128xf32>
    %cst_27 = arith.constant dense<0.000000e+00> : vector<16x128xf32>
    %44 = tpu.matmul %41, %43, %cst_27 {dimension_numbers = #tpu.dot_dimension_numbers<[1], [0], [0], [1], [0, 0, 1, 1], [], []>} : vector<16x32xf32>, vector<32x128xf32>, vector<16x128xf32> -> vector<16x128xf32>
    %c1 = arith.constant 1 : index
    %c0_28 = arith.constant 0 : index
    %c0_29 = arith.constant 0 : index
    %45 = vector.load %arg4[%c1, %c0_28, %c0_29] : memref<9x32x128xf32, #tpu.memory_space<vmem>>, vector<1x32x128xf32>
    %46 = vector.shape_cast %45 : vector<1x32x128xf32> to vector<32x128xf32>
    %cst_30 = arith.constant dense<0.000000e+00> : vector<16x128xf32>
    %47 = tpu.matmul %41, %46, %cst_30 {dimension_numbers = #tpu.dot_dimension_numbers<[1], [0], [0], [1], [0, 0, 1, 1], [], []>} : vector<16x32xf32>, vector<32x128xf32>, vector<16x128xf32> -> vector<16x128xf32>
    %c2 = arith.constant 2 : index
    %c0_31 = arith.constant 0 : index
    %c0_32 = arith.constant 0 : index
    %48 = vector.load %arg4[%c2, %c0_31, %c0_32] : memref<9x32x128xf32, #tpu.memory_space<vmem>>, vector<1x32x128xf32>
    %49 = vector.shape_cast %48 : vector<1x32x128xf32> to vector<32x128xf32>
    %cst_33 = arith.constant dense<0.000000e+00> : vector<16x128xf32>
    %50 = tpu.matmul %41, %49, %cst_33 {dimension_numbers = #tpu.dot_dimension_numbers<[1], [0], [0], [1], [0, 0, 1, 1], [], []>} : vector<16x32xf32>, vector<32x128xf32>, vector<16x128xf32> -> vector<16x128xf32>
    %c3 = arith.constant 3 : index
    %c0_34 = arith.constant 0 : index
    %c0_35 = arith.constant 0 : index
    %51 = vector.load %arg4[%c3, %c0_34, %c0_35] : memref<9x32x128xf32, #tpu.memory_space<vmem>>, vector<1x32x128xf32>
    %52 = vector.shape_cast %51 : vector<1x32x128xf32> to vector<32x128xf32>
    %cst_36 = arith.constant dense<0.000000e+00> : vector<16x128xf32>
    %53 = tpu.matmul %41, %52, %cst_36 {dimension_numbers = #tpu.dot_dimension_numbers<[1], [0], [0], [1], [0, 0, 1, 1], [], []>} : vector<16x32xf32>, vector<32x128xf32>, vector<16x128xf32> -> vector<16x128xf32>
    %c4 = arith.constant 4 : index
    %c0_37 = arith.constant 0 : index
    %c0_38 = arith.constant 0 : index
    %54 = vector.load %arg4[%c4, %c0_37, %c0_38] : memref<9x32x128xf32, #tpu.memory_space<vmem>>, vector<1x32x128xf32>
    %55 = vector.shape_cast %54 : vector<1x32x128xf32> to vector<32x128xf32>
    %cst_39 = arith.constant dense<0.000000e+00> : vector<16x128xf32>
    %56 = tpu.matmul %41, %55, %cst_39 {dimension_numbers = #tpu.dot_dimension_numbers<[1], [0], [0], [1], [0, 0, 1, 1], [], []>} : vector<16x32xf32>, vector<32x128xf32>, vector<16x128xf32> -> vector<16x128xf32>
    %c5 = arith.constant 5 : index
    %c0_40 = arith.constant 0 : index
    %c0_41 = arith.constant 0 : index
    %57 = vector.load %arg4[%c5, %c0_40, %c0_41] : memref<9x32x128xf32, #tpu.memory_space<vmem>>, vector<1x32x128xf32>
    %58 = vector.shape_cast %57 : vector<1x32x128xf32> to vector<32x128xf32>
    %cst_42 = arith.constant dense<0.000000e+00> : vector<16x128xf32>
    %59 = tpu.matmul %41, %58, %cst_42 {dimension_numbers = #tpu.dot_dimension_numbers<[1], [0], [0], [1], [0, 0, 1, 1], [], []>} : vector<16x32xf32>, vector<32x128xf32>, vector<16x128xf32> -> vector<16x128xf32>
    %c6 = arith.constant 6 : index
    %c0_43 = arith.constant 0 : index
    %c0_44 = arith.constant 0 : index
    %60 = vector.load %arg4[%c6, %c0_43, %c0_44] : memref<9x32x128xf32, #tpu.memory_space<vmem>>, vector<1x32x128xf32>
    %61 = vector.shape_cast %60 : vector<1x32x128xf32> to vector<32x128xf32>
    %cst_45 = arith.constant dense<0.000000e+00> : vector<16x128xf32>
    %62 = tpu.matmul %41, %61, %cst_45 {dimension_numbers = #tpu.dot_dimension_numbers<[1], [0], [0], [1], [0, 0, 1, 1], [], []>} : vector<16x32xf32>, vector<32x128xf32>, vector<16x128xf32> -> vector<16x128xf32>
    %c7 = arith.constant 7 : index
    %c0_46 = arith.constant 0 : index
    %c0_47 = arith.constant 0 : index
    %63 = vector.load %arg4[%c7, %c0_46, %c0_47] : memref<9x32x128xf32, #tpu.memory_space<vmem>>, vector<1x32x128xf32>
    %64 = vector.shape_cast %63 : vector<1x32x128xf32> to vector<32x128xf32>
    %cst_48 = arith.constant dense<0.000000e+00> : vector<16x128xf32>
    %65 = tpu.matmul %41, %64, %cst_48 {dimension_numbers = #tpu.dot_dimension_numbers<[1], [0], [0], [1], [0, 0, 1, 1], [], []>} : vector<16x32xf32>, vector<32x128xf32>, vector<16x128xf32> -> vector<16x128xf32>
    %c8 = arith.constant 8 : index
    %c0_49 = arith.constant 0 : index
    %c0_50 = arith.constant 0 : index
    %66 = vector.load %arg4[%c8, %c0_49, %c0_50] : memref<9x32x128xf32, #tpu.memory_space<vmem>>, vector<1x32x128xf32>
    %67 = vector.shape_cast %66 : vector<1x32x128xf32> to vector<32x128xf32>
    %cst_51 = arith.constant dense<0.000000e+00> : vector<16x128xf32>
    %68 = tpu.matmul %41, %67, %cst_51 {dimension_numbers = #tpu.dot_dimension_numbers<[1], [0], [0], [1], [0, 0, 1, 1], [], []>} : vector<16x32xf32>, vector<32x128xf32>, vector<16x128xf32> -> vector<16x128xf32>
    %69 = tpu.concatenate %44, %47, %50, %53, %56, %59, %62, %65, %68 in 0 : vector<16x128xf32>, vector<16x128xf32>, vector<16x128xf32>, vector<16x128xf32>, vector<16x128xf32>, vector<16x128xf32>, vector<16x128xf32>, vector<16x128xf32>, vector<16x128xf32> -> vector<144x128xf32>
    %c0_52 = arith.constant 0 : index
    %c0_53 = arith.constant 0 : index
    %70 = vector.load %arg11[%c0_52, %c0_53] : memref<32x144xf32, #tpu.memory_space<vmem>>, vector<32x144xf32>
    %cst_54 = arith.constant dense<0.000000e+00> : vector<32x128xf32>
    %71 = tpu.matmul %70, %69, %cst_54 {dimension_numbers = #tpu.dot_dimension_numbers<[1], [0], [0], [1], [0, 0, 1, 1], [], []>} : vector<32x144xf32>, vector<144x128xf32>, vector<32x128xf32> -> vector<32x128xf32>
    %c0_55 = arith.constant 0 : index
    %c0_56 = arith.constant 0 : index
    %72 = vector.load %arg12[%c0_55, %c0_56] : memref<32x1xf32, #tpu.memory_space<vmem>>, vector<32x1xf32>
    %73 = vector.broadcast %72 : vector<32x1xf32> to vector<32x128xf32>
    %74 = arith.addf %71, %73 : vector<32x128xf32>
    %cst_57 = arith.constant dense<0.000000e+00> : vector<32xf32>
    %75 = vector.multi_reduction <add>, %74, %cst_57 [1] : vector<32x128xf32> to vector<32xf32>
    %76 = vector.shape_cast %75 : vector<32xf32> to vector<32x1xf32>
    %cst_58 = arith.constant 1.280000e+02 : f32
    %77 = vector.broadcast %cst_58 : f32 to vector<32x1xf32>
    %78 = arith.divf %76, %77 : vector<32x1xf32>
    %79 = vector.broadcast %78 : vector<32x1xf32> to vector<32x128xf32>
    %80 = arith.subf %74, %79 : vector<32x128xf32>
    %81 = arith.mulf %80, %80 : vector<32x128xf32>
    %cst_59 = arith.constant dense<0.000000e+00> : vector<32xf32>
    %82 = vector.multi_reduction <add>, %81, %cst_59 [1] : vector<32x128xf32> to vector<32xf32>
    %83 = vector.shape_cast %82 : vector<32xf32> to vector<32x1xf32>
    %cst_60 = arith.constant 1.280000e+02 : f32
    %84 = vector.broadcast %cst_60 : f32 to vector<32x1xf32>
    %85 = arith.divf %83, %84 : vector<32x1xf32>
    %86 = vector.broadcast %78 : vector<32x1xf32> to vector<32x128xf32>
    %87 = arith.subf %74, %86 : vector<32x128xf32>
    %cst_61 = arith.constant 9.99999974E-6 : f32
    %88 = vector.broadcast %cst_61 : f32 to vector<32x1xf32>
    %89 = arith.addf %85, %88 : vector<32x1xf32>
    %90 = math.rsqrt %89 : vector<32x1xf32>
    %91 = vector.broadcast %90 : vector<32x1xf32> to vector<32x128xf32>
    %92 = arith.mulf %87, %91 : vector<32x128xf32>
    %c0_62 = arith.constant 0 : index
    %c0_63 = arith.constant 0 : index
    %93 = vector.load %arg13[%c0_62, %c0_63] : memref<32x1xf32, #tpu.memory_space<vmem>>, vector<32x1xf32>
    %94 = vector.broadcast %93 : vector<32x1xf32> to vector<32x128xf32>
    %95 = arith.mulf %92, %94 : vector<32x128xf32>
    %c0_64 = arith.constant 0 : index
    %c0_65 = arith.constant 0 : index
    %96 = vector.load %arg14[%c0_64, %c0_65] : memref<32x1xf32, #tpu.memory_space<vmem>>, vector<32x1xf32>
    %97 = vector.broadcast %96 : vector<32x1xf32> to vector<32x128xf32>
    %98 = arith.addf %95, %97 : vector<32x128xf32>
    %cst_66 = arith.constant 0.000000e+00 : f32
    %99 = vector.broadcast %cst_66 : f32 to vector<32x128xf32>
    %100 = arith.cmpf ogt, %98, %99 : vector<32x128xf32>
    %cst_67 = arith.constant 1.000000e-01 : f32
    %101 = vector.broadcast %cst_67 : f32 to vector<32x128xf32>
    %102 = arith.mulf %101, %98 : vector<32x128xf32>
    %103 = arith.select %100, %98, %102 : vector<32x128xi1>, vector<32x128xf32>
    %c0_68 = arith.constant 0 : index
    %c0_69 = arith.constant 0 : index
    %104 = vector.load %arg2[%c0_68, %c0_69] : memref<32x2xf32, #tpu.memory_space<vmem>>, vector<32x2xf32>
    %c0_70 = arith.constant 0 : index
    %c0_71 = arith.constant 0 : index
    %105 = vector.load %arg1[%c0_70, %c0_71] : memref<2x8xf32, #tpu.memory_space<vmem>>, vector<2x8xf32>
    %cst_72 = arith.constant dense<0.000000e+00> : vector<32x8xf32>
    %106 = tpu.matmul %104, %105, %cst_72 {dimension_numbers = #tpu.dot_dimension_numbers<[1], [0], [0], [1], [0, 0, 1, 1], [], []>} : vector<32x2xf32>, vector<2x8xf32>, vector<32x8xf32> -> vector<32x8xf32>
    %c0_73 = arith.constant 0 : index
    %c0_74 = arith.constant 0 : index
    %107 = vector.load %arg15[%c0_73, %c0_74] : memref<8x128xf32, #tpu.memory_space<vmem>>, vector<8x128xf32>
    %cst_75 = arith.constant dense<0.000000e+00> : vector<32x128xf32>
    %108 = tpu.matmul %106, %107, %cst_75 {dimension_numbers = #tpu.dot_dimension_numbers<[1], [0], [0], [1], [0, 0, 1, 1], [], []>} : vector<32x8xf32>, vector<8x128xf32>, vector<32x128xf32> -> vector<32x128xf32>
    %c0_76 = arith.constant 0 : index
    %c0_77 = arith.constant 0 : index
    %109 = vector.load %arg16[%c0_76, %c0_77] : memref<32x128xf32, #tpu.memory_space<vmem>>, vector<32x128xf32>
    %110 = arith.mulf %108, %109 : vector<32x128xf32>
    %c0_78 = arith.constant 0 : index
    %c0_79 = arith.constant 0 : index
    %111 = vector.load %arg17[%c0_78, %c0_79] : memref<128x8xf32, #tpu.memory_space<vmem>>, vector<128x8xf32>
    %cst_80 = arith.constant dense<0.000000e+00> : vector<32x8xf32>
    %112 = tpu.matmul %110, %111, %cst_80 {dimension_numbers = #tpu.dot_dimension_numbers<[1], [0], [0], [1], [0, 0, 1, 1], [], []>} : vector<32x128xf32>, vector<128x8xf32>, vector<32x8xf32> -> vector<32x8xf32>
    %c0_81 = arith.constant 0 : index
    %c0_82 = arith.constant 0 : index
    %113 = vector.load %arg18[%c0_81, %c0_82] : memref<1x8xf32, #tpu.memory_space<vmem>>, vector<1x8xf32>
    %114 = vector.broadcast %113 : vector<1x8xf32> to vector<32x8xf32>
    %115 = arith.addf %112, %114 : vector<32x8xf32>
    %cst_83 = arith.constant dense<0.000000e+00> : vector<8xf32>
    %116 = vector.multi_reduction <add>, %115, %cst_83 [0] : vector<32x8xf32> to vector<8xf32>
    %117 = vector.shape_cast %116 : vector<8xf32> to vector<1x8xf32>
    %cst_84 = arith.constant 3.200000e+01 : f32
    %118 = vector.broadcast %cst_84 : f32 to vector<1x8xf32>
    %119 = arith.divf %117, %118 : vector<1x8xf32>
    %120 = vector.broadcast %119 : vector<1x8xf32> to vector<32x8xf32>
    %121 = arith.subf %115, %120 : vector<32x8xf32>
    %122 = arith.mulf %121, %121 : vector<32x8xf32>
    %cst_85 = arith.constant dense<0.000000e+00> : vector<8xf32>
    %123 = vector.multi_reduction <add>, %122, %cst_85 [0] : vector<32x8xf32> to vector<8xf32>
    %124 = vector.shape_cast %123 : vector<8xf32> to vector<1x8xf32>
    %cst_86 = arith.constant 3.200000e+01 : f32
    %125 = vector.broadcast %cst_86 : f32 to vector<1x8xf32>
    %126 = arith.divf %124, %125 : vector<1x8xf32>
    %127 = vector.broadcast %119 : vector<1x8xf32> to vector<32x8xf32>
    %128 = arith.subf %115, %127 : vector<32x8xf32>
    %cst_87 = arith.constant 9.99999974E-6 : f32
    %129 = vector.broadcast %cst_87 : f32 to vector<1x8xf32>
    %130 = arith.addf %126, %129 : vector<1x8xf32>
    %131 = math.rsqrt %130 : vector<1x8xf32>
    %132 = vector.broadcast %131 : vector<1x8xf32> to vector<32x8xf32>
    %133 = arith.mulf %128, %132 : vector<32x8xf32>
    %c0_88 = arith.constant 0 : index
    %c0_89 = arith.constant 0 : index
    %134 = vector.load %arg19[%c0_88, %c0_89] : memref<1x8xf32, #tpu.memory_space<vmem>>, vector<1x8xf32>
    %135 = vector.broadcast %134 : vector<1x8xf32> to vector<32x8xf32>
    %136 = arith.mulf %133, %135 : vector<32x8xf32>
    %c0_90 = arith.constant 0 : index
    %c0_91 = arith.constant 0 : index
    %137 = vector.load %arg20[%c0_90, %c0_91] : memref<1x8xf32, #tpu.memory_space<vmem>>, vector<1x8xf32>
    %138 = vector.broadcast %137 : vector<1x8xf32> to vector<32x8xf32>
    %139 = arith.addf %136, %138 : vector<32x8xf32>
    %cst_92 = arith.constant 0.000000e+00 : f32
    %140 = vector.broadcast %cst_92 : f32 to vector<32x8xf32>
    %141 = arith.cmpf ogt, %139, %140 : vector<32x8xf32>
    %cst_93 = arith.constant 0.00999999977 : f32
    %142 = vector.broadcast %cst_93 : f32 to vector<32x8xf32>
    %143 = arith.mulf %142, %139 : vector<32x8xf32>
    %144 = arith.select %141, %139, %143 : vector<32x8xi1>, vector<32x8xf32>
    %145 = tpu.transpose %144, [1, 0] : vector<32x8xf32> -> vector<8x32xf32>
    %c0_94 = arith.constant 0 : index
    %c0_95 = arith.constant 0 : index
    %c0_96 = arith.constant 0 : index
    %146 = vector.load %arg4[%c0_94, %c0_95, %c0_96] : memref<9x32x128xf32, #tpu.memory_space<vmem>>, vector<1x32x128xf32>
    %147 = vector.shape_cast %146 : vector<1x32x128xf32> to vector<32x128xf32>
    %cst_97 = arith.constant dense<0.000000e+00> : vector<8x128xf32>
    %148 = tpu.matmul %145, %147, %cst_97 {dimension_numbers = #tpu.dot_dimension_numbers<[1], [0], [0], [1], [0, 0, 1, 1], [], []>} : vector<8x32xf32>, vector<32x128xf32>, vector<8x128xf32> -> vector<8x128xf32>
    %c1_98 = arith.constant 1 : index
    %c0_99 = arith.constant 0 : index
    %c0_100 = arith.constant 0 : index
    %149 = vector.load %arg4[%c1_98, %c0_99, %c0_100] : memref<9x32x128xf32, #tpu.memory_space<vmem>>, vector<1x32x128xf32>
    %150 = vector.shape_cast %149 : vector<1x32x128xf32> to vector<32x128xf32>
    %cst_101 = arith.constant dense<0.000000e+00> : vector<8x128xf32>
    %151 = tpu.matmul %145, %150, %cst_101 {dimension_numbers = #tpu.dot_dimension_numbers<[1], [0], [0], [1], [0, 0, 1, 1], [], []>} : vector<8x32xf32>, vector<32x128xf32>, vector<8x128xf32> -> vector<8x128xf32>
    %c2_102 = arith.constant 2 : index
    %c0_103 = arith.constant 0 : index
    %c0_104 = arith.constant 0 : index
    %152 = vector.load %arg4[%c2_102, %c0_103, %c0_104] : memref<9x32x128xf32, #tpu.memory_space<vmem>>, vector<1x32x128xf32>
    %153 = vector.shape_cast %152 : vector<1x32x128xf32> to vector<32x128xf32>
    %cst_105 = arith.constant dense<0.000000e+00> : vector<8x128xf32>
    %154 = tpu.matmul %145, %153, %cst_105 {dimension_numbers = #tpu.dot_dimension_numbers<[1], [0], [0], [1], [0, 0, 1, 1], [], []>} : vector<8x32xf32>, vector<32x128xf32>, vector<8x128xf32> -> vector<8x128xf32>
    %c3_106 = arith.constant 3 : index
    %c0_107 = arith.constant 0 : index
    %c0_108 = arith.constant 0 : index
    %155 = vector.load %arg4[%c3_106, %c0_107, %c0_108] : memref<9x32x128xf32, #tpu.memory_space<vmem>>, vector<1x32x128xf32>
    %156 = vector.shape_cast %155 : vector<1x32x128xf32> to vector<32x128xf32>
    %cst_109 = arith.constant dense<0.000000e+00> : vector<8x128xf32>
    %157 = tpu.matmul %145, %156, %cst_109 {dimension_numbers = #tpu.dot_dimension_numbers<[1], [0], [0], [1], [0, 0, 1, 1], [], []>} : vector<8x32xf32>, vector<32x128xf32>, vector<8x128xf32> -> vector<8x128xf32>
    %c4_110 = arith.constant 4 : index
    %c0_111 = arith.constant 0 : index
    %c0_112 = arith.constant 0 : index
    %158 = vector.load %arg4[%c4_110, %c0_111, %c0_112] : memref<9x32x128xf32, #tpu.memory_space<vmem>>, vector<1x32x128xf32>
    %159 = vector.shape_cast %158 : vector<1x32x128xf32> to vector<32x128xf32>
    %cst_113 = arith.constant dense<0.000000e+00> : vector<8x128xf32>
    %160 = tpu.matmul %145, %159, %cst_113 {dimension_numbers = #tpu.dot_dimension_numbers<[1], [0], [0], [1], [0, 0, 1, 1], [], []>} : vector<8x32xf32>, vector<32x128xf32>, vector<8x128xf32> -> vector<8x128xf32>
    %c5_114 = arith.constant 5 : index
    %c0_115 = arith.constant 0 : index
    %c0_116 = arith.constant 0 : index
    %161 = vector.load %arg4[%c5_114, %c0_115, %c0_116] : memref<9x32x128xf32, #tpu.memory_space<vmem>>, vector<1x32x128xf32>
    %162 = vector.shape_cast %161 : vector<1x32x128xf32> to vector<32x128xf32>
    %cst_117 = arith.constant dense<0.000000e+00> : vector<8x128xf32>
    %163 = tpu.matmul %145, %162, %cst_117 {dimension_numbers = #tpu.dot_dimension_numbers<[1], [0], [0], [1], [0, 0, 1, 1], [], []>} : vector<8x32xf32>, vector<32x128xf32>, vector<8x128xf32> -> vector<8x128xf32>
    %c6_118 = arith.constant 6 : index
    %c0_119 = arith.constant 0 : index
    %c0_120 = arith.constant 0 : index
    %164 = vector.load %arg4[%c6_118, %c0_119, %c0_120] : memref<9x32x128xf32, #tpu.memory_space<vmem>>, vector<1x32x128xf32>
    %165 = vector.shape_cast %164 : vector<1x32x128xf32> to vector<32x128xf32>
    %cst_121 = arith.constant dense<0.000000e+00> : vector<8x128xf32>
    %166 = tpu.matmul %145, %165, %cst_121 {dimension_numbers = #tpu.dot_dimension_numbers<[1], [0], [0], [1], [0, 0, 1, 1], [], []>} : vector<8x32xf32>, vector<32x128xf32>, vector<8x128xf32> -> vector<8x128xf32>
    %c7_122 = arith.constant 7 : index
    %c0_123 = arith.constant 0 : index
    %c0_124 = arith.constant 0 : index
    %167 = vector.load %arg4[%c7_122, %c0_123, %c0_124] : memref<9x32x128xf32, #tpu.memory_space<vmem>>, vector<1x32x128xf32>
    %168 = vector.shape_cast %167 : vector<1x32x128xf32> to vector<32x128xf32>
    %cst_125 = arith.constant dense<0.000000e+00> : vector<8x128xf32>
    %169 = tpu.matmul %145, %168, %cst_125 {dimension_numbers = #tpu.dot_dimension_numbers<[1], [0], [0], [1], [0, 0, 1, 1], [], []>} : vector<8x32xf32>, vector<32x128xf32>, vector<8x128xf32> -> vector<8x128xf32>
    %c8_126 = arith.constant 8 : index
    %c0_127 = arith.constant 0 : index
    %c0_128 = arith.constant 0 : index
    %170 = vector.load %arg4[%c8_126, %c0_127, %c0_128] : memref<9x32x128xf32, #tpu.memory_space<vmem>>, vector<1x32x128xf32>
    %171 = vector.shape_cast %170 : vector<1x32x128xf32> to vector<32x128xf32>
    %cst_129 = arith.constant dense<0.000000e+00> : vector<8x128xf32>
    %172 = tpu.matmul %145, %171, %cst_129 {dimension_numbers = #tpu.dot_dimension_numbers<[1], [0], [0], [1], [0, 0, 1, 1], [], []>} : vector<8x32xf32>, vector<32x128xf32>, vector<8x128xf32> -> vector<8x128xf32>
    %173 = tpu.concatenate %148, %151, %154, %157, %160, %163, %166, %169, %172 in 0 : vector<8x128xf32>, vector<8x128xf32>, vector<8x128xf32>, vector<8x128xf32>, vector<8x128xf32>, vector<8x128xf32>, vector<8x128xf32>, vector<8x128xf32>, vector<8x128xf32> -> vector<72x128xf32>
    %c0_130 = arith.constant 0 : index
    %c0_131 = arith.constant 0 : index
    %174 = vector.load %arg21[%c0_130, %c0_131] : memref<32x72xf32, #tpu.memory_space<vmem>>, vector<32x72xf32>
    %cst_132 = arith.constant dense<0.000000e+00> : vector<32x128xf32>
    %175 = tpu.matmul %174, %173, %cst_132 {dimension_numbers = #tpu.dot_dimension_numbers<[1], [0], [0], [1], [0, 0, 1, 1], [], []>} : vector<32x72xf32>, vector<72x128xf32>, vector<32x128xf32> -> vector<32x128xf32>
    %c0_133 = arith.constant 0 : index
    %c0_134 = arith.constant 0 : index
    %176 = vector.load %arg22[%c0_133, %c0_134] : memref<32x1xf32, #tpu.memory_space<vmem>>, vector<32x1xf32>
    %177 = vector.broadcast %176 : vector<32x1xf32> to vector<32x128xf32>
    %178 = arith.addf %175, %177 : vector<32x128xf32>
    %cst_135 = arith.constant dense<0.000000e+00> : vector<32xf32>
    %179 = vector.multi_reduction <add>, %178, %cst_135 [1] : vector<32x128xf32> to vector<32xf32>
    %180 = vector.shape_cast %179 : vector<32xf32> to vector<32x1xf32>
    %cst_136 = arith.constant 1.280000e+02 : f32
    %181 = vector.broadcast %cst_136 : f32 to vector<32x1xf32>
    %182 = arith.divf %180, %181 : vector<32x1xf32>
    %183 = vector.broadcast %182 : vector<32x1xf32> to vector<32x128xf32>
    %184 = arith.subf %178, %183 : vector<32x128xf32>
    %185 = arith.mulf %184, %184 : vector<32x128xf32>
    %cst_137 = arith.constant dense<0.000000e+00> : vector<32xf32>
    %186 = vector.multi_reduction <add>, %185, %cst_137 [1] : vector<32x128xf32> to vector<32xf32>
    %187 = vector.shape_cast %186 : vector<32xf32> to vector<32x1xf32>
    %cst_138 = arith.constant 1.280000e+02 : f32
    %188 = vector.broadcast %cst_138 : f32 to vector<32x1xf32>
    %189 = arith.divf %187, %188 : vector<32x1xf32>
    %190 = vector.broadcast %182 : vector<32x1xf32> to vector<32x128xf32>
    %191 = arith.subf %178, %190 : vector<32x128xf32>
    %cst_139 = arith.constant 9.99999974E-6 : f32
    %192 = vector.broadcast %cst_139 : f32 to vector<32x1xf32>
    %193 = arith.addf %189, %192 : vector<32x1xf32>
    %194 = math.rsqrt %193 : vector<32x1xf32>
    %195 = vector.broadcast %194 : vector<32x1xf32> to vector<32x128xf32>
    %196 = arith.mulf %191, %195 : vector<32x128xf32>
    %c0_140 = arith.constant 0 : index
    %c0_141 = arith.constant 0 : index
    %197 = vector.load %arg23[%c0_140, %c0_141] : memref<32x1xf32, #tpu.memory_space<vmem>>, vector<32x1xf32>
    %198 = vector.broadcast %197 : vector<32x1xf32> to vector<32x128xf32>
    %199 = arith.mulf %196, %198 : vector<32x128xf32>
    %c0_142 = arith.constant 0 : index
    %c0_143 = arith.constant 0 : index
    %200 = vector.load %arg24[%c0_142, %c0_143] : memref<32x1xf32, #tpu.memory_space<vmem>>, vector<32x1xf32>
    %201 = vector.broadcast %200 : vector<32x1xf32> to vector<32x128xf32>
    %202 = arith.addf %199, %201 : vector<32x128xf32>
    %cst_144 = arith.constant 0.000000e+00 : f32
    %203 = vector.broadcast %cst_144 : f32 to vector<32x128xf32>
    %204 = arith.cmpf ogt, %202, %203 : vector<32x128xf32>
    %cst_145 = arith.constant 1.000000e-01 : f32
    %205 = vector.broadcast %cst_145 : f32 to vector<32x128xf32>
    %206 = arith.mulf %205, %202 : vector<32x128xf32>
    %207 = arith.select %204, %202, %206 : vector<32x128xi1>, vector<32x128xf32>
    %c0_146 = arith.constant 0 : index
    %c0_147 = arith.constant 0 : index
    %208 = vector.load %arg0[%c0_146, %c0_147] : memref<2x8xf32, #tpu.memory_space<vmem>>, vector<2x8xf32>
    %c0_148 = arith.constant 0 : index
    %c0_149 = arith.constant 0 : index
    %209 = vector.load %arg25[%c0_148, %c0_149] : memref<8x32xf32, #tpu.memory_space<vmem>>, vector<8x32xf32>
    %cst_150 = arith.constant dense<0.000000e+00> : vector<2x32xf32>
    %210 = tpu.matmul %208, %209, %cst_150 {dimension_numbers = #tpu.dot_dimension_numbers<[1], [0], [0], [1], [0, 0, 1, 1], [], []>} : vector<2x8xf32>, vector<8x32xf32>, vector<2x32xf32> -> vector<2x32xf32>
    %c0_151 = arith.constant 0 : index
    %c0_152 = arith.constant 0 : index
    %211 = vector.load %arg26[%c0_151, %c0_152] : memref<1x32xf32, #tpu.memory_space<vmem>>, vector<1x32xf32>
    %212 = vector.broadcast %211 : vector<1x32xf32> to vector<2x32xf32>
    %213 = arith.addf %210, %212 : vector<2x32xf32>
    %cst_153 = arith.constant 0.000000e+00 : f32
    %214 = vector.broadcast %cst_153 : f32 to vector<2x32xf32>
    %215 = arith.maximumf %213, %214 : vector<2x32xf32>
    %c0_154 = arith.constant 0 : index
    %c0_155 = arith.constant 0 : index
    %216 = vector.load %arg27[%c0_154, %c0_155] : memref<32x32xf32, #tpu.memory_space<vmem>>, vector<32x32xf32>
    %cst_156 = arith.constant dense<0.000000e+00> : vector<2x32xf32>
    %217 = tpu.matmul %215, %216, %cst_156 {dimension_numbers = #tpu.dot_dimension_numbers<[1], [0], [0], [1], [0, 0, 1, 1], [], []>} : vector<2x32xf32>, vector<32x32xf32>, vector<2x32xf32> -> vector<2x32xf32>
    %c0_157 = arith.constant 0 : index
    %c0_158 = arith.constant 0 : index
    %218 = vector.load %arg28[%c0_157, %c0_158] : memref<1x32xf32, #tpu.memory_space<vmem>>, vector<1x32xf32>
    %219 = vector.broadcast %218 : vector<1x32xf32> to vector<2x32xf32>
    %220 = arith.addf %217, %219 : vector<2x32xf32>
    %c0_159 = arith.constant 0 : index
    %c0_160 = arith.constant 0 : index
    %221 = vector.load %arg3[%c0_159, %c0_160] : memref<128x2xf32, #tpu.memory_space<vmem>>, vector<128x2xf32>
    %cst_161 = arith.constant dense<0.000000e+00> : vector<128x32xf32>
    %222 = tpu.matmul %221, %220, %cst_161 {dimension_numbers = #tpu.dot_dimension_numbers<[1], [0], [0], [1], [0, 0, 1, 1], [], []>} : vector<128x2xf32>, vector<2x32xf32>, vector<128x32xf32> -> vector<128x32xf32>
    %223 = tpu.transpose %222, [1, 0] : vector<128x32xf32> -> vector<32x128xf32>
    %224 = arith.mulf %223, %207 : vector<32x128xf32>
    %225 = arith.addf %224, %103 : vector<32x128xf32>
    %c0_162 = arith.constant 0 : index
    %c0_163 = arith.constant 0 : index
    %226 = vector.load %arg29[%c0_162, %c0_163] : memref<32x128xf32, #tpu.memory_space<vmem>>, vector<32x128xf32>
    tpu.vector_store %arg29[%c0_162, %c0_163], %225 {strides = array<i32>} : memref<32x128xf32, #tpu.memory_space<vmem>>, vector<32x128xf32>,
    return
  }
}

</mosaic_0001>

<bundles_post_ra>
// kernel: oogan_forward.1
= control target key start
LH: loop header
LB: loop body
LE: loop exit
PB: predicated region body
PF: predicated region fallthrough
CT: control target
= control target key end

     0   :  { %s2016_s6 = smov 1   ;;  %s2017_s10 = smov 2   ;;  %s2714_s0 = inlined_call_operand.smem [shape: u32[30], index: -1, kind: input, shape index: {}] }
   0x1   :  { %s2059_s5 = sld [smem:[%s2714_s0]]   ;;  %s2018_s14 = smov 3  }
   0x2   :  { %s2064_s9 = sld [smem:[%s2714_s0 + %s2016_s6]]   ;;  %s2019_s18 = smov 4  }
   0x3   :  { %s2069_s13 = sld [smem:[%s2714_s0 + %s2017_s10]]   ;;  %s2020_s22 = smov 5  }
   0x4   :  { %s2074_s17 = sld [smem:[%s2714_s0 + %s2018_s14]]   ;;  %s2021_s26 = smov 6  }
   0x5   :  { %s2079_s21 = sld [smem:[%s2714_s0 + %s2019_s18]]   ;;  %s2022_s30 = smov 7  }
   0x6   :  { %s2084_s25 = sld [smem:[%s2714_s0 + %s2020_s22]]   ;;  %s2023_s4 = smov 8  }
   0x7   :  { %s2089_s29 = sld [smem:[%s2714_s0 + %s2021_s26]]   ;;  %s2024_s10 = smov 9  }
   0x8   :  { %s2094_s3 = sld [smem:[%s2714_s0 + %s2022_s30]]   ;;  %s2025_s15 = smov 10  }
   0x9   :  { %s2099_s8 = sld [smem:[%s2714_s0 + %s2023_s4]]   ;;  %s2026_s20 = smov 11  }
   0xa   :  { %2723 = sst [smem:[#allocation5_spill]] %s2074_s17  ;;  %s2027_s26 = smov 12  }
   0xb   :  { %s2104_s14 = sld [smem:[%s2714_s0 + %s2024_s10]]   ;;  %s2028_s1 = smov 13  }
   0xc   :  { %s2109_s19 = sld [smem:[%s2714_s0 + %s2025_s15]]   ;;  %s2029_s7 = smov 14  }
   0xd   :  { %s2114_s24 = sld [smem:[%s2714_s0 + %s2026_s20]]   ;;  %s2030_s15 = smov 15  }
   0xe   :  { %s2119_s30 = sld [smem:[%s2714_s0 + %s2027_s26]]   ;;  %s2031_s22 = smov 16  }
   0xf   :  { %s2124_s6 = sld [smem:[%s2714_s0 + %s2028_s1]]   ;;  %s2032_s28 = smov 17  }
  0x10   :  { %s2129_s12 = sld [smem:[%s2714_s0 + %s2029_s7]]   ;;  %s2033_s7 = smov 18  }
  0x11   :  { %s2134_s20 = sld [smem:[%s2714_s0 + %s2030_s15]]   ;;  %s2034_s15 = smov 19  }
  0x12   :  { %s2139_s27 = sld [smem:[%s2714_s0 + %s2031_s22]]   ;;  %s2035_s22 = smov 20  }
  0x13   :  { %s2144_s4 = sld [smem:[%s2714_s0 + %s2032_s28]]   ;;  %s2036_s28 = smov 21  }
  0x14   :  { %s2149_s17 = sld [smem:[%s2714_s0 + %s2033_s7]]   ;;  %s2037_s7 = smov 22  }
  0x15   :  { %2724 = sst [smem:[#allocation6_spill]] %s2124_s6 }
  0x16   :  { %2725 = sst [smem:[#allocation7_spill]] %s2129_s12 }
  0x17   :  { %s2154_s12 = sld [smem:[%s2714_s0 + %s2034_s15]]   ;;  %s2038_s15 = smov 23  }
  0x18   :  { %2726 = sst [smem:[#allocation8_spill]] %s2139_s27 }
  0x19   :  { %s2159_s6 = sld [smem:[%s2714_s0 + %s2035_s22]]   ;;  %s2039_s22 = smov 24  }
  0x1a   :  { %2727 = sst [smem:[#allocation9_spill]] %s2149_s17 }
  0x1b   :  { %s2164_s27 = sld [smem:[%s2714_s0 + %s2036_s28]]   ;;  %s2040_s28 = smov 25  }
  0x1c   :  { %s2169_s17 = sld [smem:[%s2714_s0 + %s2037_s7]]   ;;  %s2041_s7 = smov 26  }
  0x1d   :  { %2728 = sst [smem:[#allocation10_spill]] %s2154_s12 }
  0x1e   :  { %s2174_s12 = sld [smem:[%s2714_s0 + %s2038_s15]]   ;;  %s2042_s15 = smov 27  }
  0x1f   :  { %2729 = sst [smem:[#allocation11_spill]] %s2159_s6 }
  0x20   :  { %s2179_s6 = sld [smem:[%s2714_s0 + %s2039_s22]]   ;;  %s2043_s22 = smov 28  }
  0x21   :  { %2730 = sst [smem:[#allocation12_spill]] %s2164_s27 }
  0x22   :  { %2731 = sst [smem:[#allocation13_spill]] %s2169_s17 }
  0x23   :  { %s2184_s27 = sld [smem:[%s2714_s0 + %s2040_s28]]   ;;  %s2044_s28 = smov 29  }
  0x24   :  { %2732 = sst [smem:[#allocation14_spill]] %s2174_s12 }
  0x25   :  { %s2189_s17 = sld [smem:[%s2714_s0 + %s2041_s7]]  }
  0x26   :  { %2733 = sst [smem:[#allocation15_spill]] %s2179_s6 }
  0x27   :  { %s2194_s12 = sld [smem:[%s2714_s0 + %s2042_s15]]  }
  0x28   :  { %s2199_s6 = sld [smem:[%s2714_s0 + %s2043_s22]]  }
  0x29   :  { %2734 = sst [smem:[#allocation16_spill]] %s2184_s27 }
  0x2a   :  { %s2204_s27 = sld [smem:[%s2714_s0 + %s2044_s28]]  }
  0x2b   :  { %64 = vsyncpa [#allocation3], 0  ;;  %s77_s7 = sshll.u32 %s2079_s21, 4  ;;  %s2045_s10 = smov [#allocation2]   ;;  %s78_s7 = int_to_ptr.hbm [resolvable:$true] %s77_s7 }
  0x2c   :  { %s79_s11 = sshll.u32 %s2045_s10, 4  ;;  %s1990_s15 = sshra.s32 %s78_s7, 4  ;;  %s80_s11 = int_to_ptr.vmem [resolvable:$true] %s79_s11  ;;  %s1991_s15 = int_to_ptr.hbm [resolvable:$true] %s1990_s15 }
  0x2d   :  { %s1992_s16 = scalar_lea.hbm %s1991_s15, 288  ;;  %s1994_s18 = scalar_lea.hbm %s2079_s21, 288 }
  0x2e   :  { %p1993_p0 = scmp.ne.s32.totalorder %s1991_s15, %s1992_s16  ;;  %p1995_p1 = scmp.lt.s32.totalorder %s1991_s15, %s2079_s21 }
  0x2f   :  { %p1996_p2 = scmp.lt.s32.totalorder %s1994_s18, %s1992_s16 }
  0x31   :  { %p1997_p3 = por %p1996_p2, %p1995_p1 }
  0x33   :  { %p1998_p4 = pnand %p1997_p3, %p1993_p0 }
  0x35   :  { %2001 = shalt.err (!%p1998_p4)
}
  0x36   :  { %s2046_s0 = smov 128   ;;  %s2047_s22 = smov 8  }
  0x37   :  { %85 = dma.hbm_to_vmem [thread:$0]  %s78_s7, 4608, %s80_s11, [#allocation3], %s2046_s0, %s2046_s0, %s2047_s22  }
  0x38   :  { %2014 = dma.done.wait [#allocation3], 4608  }
  0x39   :  { %2015 = vsyncadd [#allocation3], 4294962688  ;;  %vm156_vm0 = vcmask 1041408   ;;  %vm143_vm1 = vcmask 15360   ;;  %v142_v0 = vld [vmem:[%s2059_s5] sm:$0x3] }
  0x3a   :  { %v2211_v1 = vld [vmem:[%s2069_s13] sm:$0xff]  ;;  %1836 = vmatpush.msk.msra.mxu0 %vm156_vm0, %v142_v0  ;;  %v2217_v2 = vld [vmem:[%s2069_s13 + $0x8] sm:$0xff]  ;;  %v2222_v3 = vld [vmem:[%s2069_s13 + $0x10] sm:$0xff]  ;;  %vm190_vm2 = vcmask 64512   ;;  %v2048_v40 = vmov 32.0   ;;  %vm289_vm3 = vcmask 130048  }
  0x3b   :  { %1837 = vmatmul.msk.f32.vlgmr.msra.gmra.mxu0 %vm143_vm1, %v2211_v1  ;;  %v2227_v4 = vld [vmem:[%s2069_s13 + $0x18] sm:$0xff]  ;;  %v189_v5 = vld [vmem:[%s2084_s25] sm:$0xff]  ;;  %v254_v7 = vld [vmem:[%s2094_s3 + $0x70] sm:$0xff]  ;;  %1965 = vrcp.f32 %v2048_v40  ;;  %vm412_vm12 = vcmask 261120   ;;  %s2736_s13 = sld [smem:[#allocation9_spill]] }
  0x3c   :  { %218 = vmatpush.msra.mxu1 %v189_v5  ;;  %v255_v6 = vld [vmem:[%s2094_s3 + $0x78] sm:$0xff]  ;;  %v253_v8 = vld [vmem:[%s2094_s3 + $0x68] sm:$0xff]  ;;  %v252_v9 = vld [vmem:[%s2094_s3 + $0x60] sm:$0xff]  ;;  %s2737_s21 = sld [smem:[#allocation10_spill]] }
  0x3d   :  { %260 = vmatpush.msra.mxu2 %v255_v6  ;;  %v251_v10 = vld [vmem:[%s2094_s3 + $0x58] sm:$0xff]  ;;  %v250_v12 = vld [vmem:[%s2094_s3 + $0x50] sm:$0xff]  ;;  %v249_v13 = vld [vmem:[%s2094_s3 + $0x48] sm:$0xff]  ;;  %s2738_s25 = sld [smem:[#allocation11_spill]] }
  0x3e   :  { %v248_v14 = vld [vmem:[%s2094_s3 + $0x40] sm:$0xff]  ;;  %v247_v15 = vld [vmem:[%s2094_s3 + $0x38] sm:$0xff]  ;;  %v246_v17 = vld [vmem:[%s2094_s3 + $0x30] sm:$0xff] }
  0x3f   :  { %261 = vmatpush.msra.mxu2 %v254_v7  ;;  %v245_v18 = vld [vmem:[%s2094_s3 + $0x28] sm:$0xff]  ;;  %v244_v19 = vld [vmem:[%s2094_s3 + $0x20] sm:$0xff]  ;;  %v243_v20 = vld [vmem:[%s2094_s3 + $0x18] sm:$0xff] }
  0x40   :  { %v242_v22 = vld [vmem:[%s2094_s3 + $0x10] sm:$0xff]  ;;  %v241_v24 = vld [vmem:[%s2094_s3 + $0x8] sm:$0xff]  ;;  %v240_v25 = vld [vmem:[%s2094_s3] sm:$0xff]  ;;  %s2740_s3 = sld [smem:[#allocation6_spill]] }
  0x41   :  { %262 = vmatpush.msra.mxu2 %v253_v8  ;;  %v232_v26 = vld [vmem:[%s2089_s29] sm:$0xff]  ;;  %v233_v29 = vld [vmem:[%s2089_s29 + $0x8] sm:$0xff]  ;;  %v234_v32 = vld [vmem:[%s2089_s29 + $0x10] sm:$0xff]  ;;  %v1966_v46 = vpop.eup %1965 }
  0x42   :  { %v235_v35 = vld [vmem:[%s2089_s29 + $0x18] sm:$0xff]  ;;  %v1957_v41 = vld [vmem:[%s2099_s8] ss:$0 sm:$0xff]  ;;  %v304_v50 = vmul.f32 32.0, %v1966_v46  ;;  %vm308_vm4 = vweird.f32 %v1966_v46  ;;  %s2739_s29 = sld [smem:[#allocation16_spill]] }
  0x43   :  { %1838 = vmatmul.msk.f32.gmra.mxu0 %vm143_vm1, %v2217_v2  ;;  %263 = vmatpush.msra.mxu2 %v252_v9  ;;  %v1959_v40 = vld [vmem:[%s2109_s19] ss:$0 sm:$0xff]  ;;  %s2741_s8 = sld [smem:[#allocation7_spill]] }
  0x44   :  { %v305_v56 = vsub.f32 1.0, %v304_v50  ;;  %v2289_v50 = vld [vmem:[#allocation2 + $0x48] sm:$0xff]  ;;  %s2744_s19 = sld [smem:[#allocation12_spill]] }
  0x45   :  { %264 = vmatpush.msra.mxu2 %v251_v10 }
  0x46   :  { %v306_v59 = vmul.f32 %v1966_v46, %v305_v56 }
  0x47   :  { %265 = vmatpush.msra.mxu2 %v250_v12 }
  0x48   :  { %v307_v62 = vadd.f32 %v1966_v46, %v306_v59 }
  0x49   :  { %266 = vmatpush.msra.mxu2 %v249_v13 }
  0x4a   :  { %v2261_v5 = vsel %vm308_vm4, %v1966_v46, %v307_v62  ;;  %v2282_v46 = vld [vmem:[#allocation2 + $0x50] sm:$0xff] }
  0x4b   :  { %1839 = vmatmul.msk.f32.gmra.mxu0 %vm143_vm1, %v2222_v3  ;;  %267 = vmatpush.msra.mxu2 %v248_v14 }
  0x4d   :  { %268 = vmatpush.msra.mxu2 %v247_v15 }
  0x4f   :  { %269 = vmatpush.msra.mxu2 %v246_v17 }
  0x51   :  { %270 = vmatpush.msra.mxu2 %v245_v18 }
  0x53   :  { %1840 = vmatmul.msk.f32.gmra.mxu0 %vm143_vm1, %v2227_v4  ;;  %271 = vmatpush.msra.mxu2 %v244_v19 }
  0x55   :  { %272 = vmatpush.msra.mxu2 %v243_v20 }
  0x57   :  { %273 = vmatpush.msra.mxu2 %v242_v22 }
  0x59   :  { %274 = vmatpush.msra.mxu2 %v241_v24 }
  0x5b   :  { %275 = vmatpush.msra.mxu2 %v240_v25 }
  0xb8   :  { %v177_v11 = vpop.f32.mrf.mxu0 }
  0xb9   :  { %1841 = vmatmul.msk.f32.vlgmr.msra.gmra.mxu1 %vm190_vm2, %v177_v11 }
  0xc0   :  { %v180_v16 = vpop.f32.mrf.mxu0 }
  0xc1   :  { %1842 = vmatmul.msk.f32.gmra.mxu1 %vm190_vm2, %v180_v16 }
  0xc8   :  { %v183_v21 = vpop.f32.mrf.mxu0 }
  0xc9   :  { %1843 = vmatmul.msk.f32.gmra.mxu1 %vm190_vm2, %v183_v21 }
  0xd0   :  { %v186_v23 = vpop.f32.mrf.mxu0 }
  0xd1   :  { %1844 = vmatmul.msk.f32.gmra.mxu1 %vm190_vm2, %v186_v23 }
 0x136   :  { %v220_v27 = vpop.f32.mrf.mxu1 }
 0x137   :  { %v236_v28 = vmul.f32 %v232_v26, %v220_v27 }
 0x139   :  { %276 = vmatmul.f32.vlgmr.msra.gmra.mxu2 %v236_v28 }
 0x13e   :  { %v223_v30 = vpop.f32.mrf.mxu1 }
 0x13f   :  { %v237_v31 = vmul.f32 %v233_v29, %v223_v30 }
 0x141   :  { %279 = vmatmul.f32.gmra.mxu2 %v237_v31 }
 0x146   :  { %v226_v33 = vpop.f32.mrf.mxu1 }
 0x147   :  { %v238_v34 = vmul.f32 %v234_v32, %v226_v33 }
 0x149   :  { %282 = vmatmul.f32.gmra.mxu2 %v238_v34 }
 0x14e   :  { %v229_v36 = vpop.f32.mrf.mxu1 }
 0x14f   :  { %v239_v37 = vmul.f32 %v235_v35, %v229_v36 }
 0x151   :  { %285 = vmatmul.f32.gmra.mxu2 %v239_v37  ;;  %v1958_v37 = vld [vmem:[%s2104_s14] ss:$0 sm:$0xff]  ;;  %s2743_s14 = sld [smem:[#allocation14_spill]] }
 0x1bc   :  { %v277_v38 = vpop.f32.mrf.mxu2 }
 0x1bd   :  { %v278_v44 = vadd.f32 %v1957_v41, %v277_v38 }
 0x1bf   :  { %v290_v48 = vsel %vm289_vm3, %v278_v44, 0.0 }
 0x1c4   :  { %v280_v39 = vpop.f32.mrf.mxu2 }
 0x1c5   :  { %v281_v43 = vadd.f32 %v1957_v41, %v280_v39 }
 0x1c7   :  { %v291_v47 = vsel %vm289_vm3, %v281_v43, 0.0 }
 0x1c8   :  { %v292_v51 = vadd.f32 %v291_v47, %v290_v48  ;;  %v2285_v47 = vld [vmem:[#allocation2 + $0x8] sm:$0xff] }
 0x1cc   :  { %v283_v42 = vpop.f32.mrf.mxu2 }
 0x1cd   :  { %v284_v45 = vadd.f32 %v1957_v41, %v283_v42  ;;  %v2275_v42 = vld [vmem:[#allocation2 + $0x18] sm:$0xff] }
 0x1ce   :  { %431 = vmatpush.msrb.mxu1 %v2275_v42  ;;  %1908 = vmatpush.msra.mxu3 %v2275_v42 }
 0x1cf   :  { %v293_v49 = vsel %vm289_vm3, %v284_v45, 0.0 }
 0x1d0   :  { %v294_v54 = vadd.f32 %v293_v49, %v292_v51  ;;  %v2292_v51 = vld [vmem:[#allocation2] sm:$0xff] }
 0x1d4   :  { %v286_v52 = vpop.f32.mrf.mxu2 }
 0x1d5   :  { %v287_v53 = vadd.f32 %v1957_v41, %v286_v52 }
 0x1d7   :  { %v295_v55 = vsel %vm289_vm3, %v287_v53, 0.0 }
 0x1d8   :  { %v296_v57 = vadd.f32 %v295_v55, %v294_v54 }
 0x1da   :  { %v297_v58 = vrot.slane %v296_v57, 4 }
 0x1dc   :  { %v298_v60 = vadd.f32 %v297_v58, %v296_v57 }
 0x1de   :  { %v299_v61 = vrot.slane %v298_v60, 2 }
 0x1e0   :  { %v300_v63 = vadd.f32 %v299_v61, %v298_v60 }
 0x1e2   :  { %v301_v0 = vrot.slane %v300_v63, 1 }
 0x1e4   :  { %v302_v6 = vadd.f32 %v301_v0, %v300_v63 }
 0x1e6   :  { %v310_v7 = vmul.f32 %v2261_v5, %v302_v6 }
 0x1e8   :  { %v311_v8 = vsub.f32 %v278_v44, %v310_v7  ;;  %v312_v9 = vsub.f32 %v281_v43, %v310_v7  ;;  %v313_v10 = vsub.f32 %v284_v45, %v310_v7  ;;  %v2264_v11 = vsub.f32 %v287_v53, %v310_v7  ;;  %v2277_v43 = vld [vmem:[#allocation2 + $0x58] sm:$0xff]  ;;  %v2279_v44 = vld [vmem:[#allocation2 + $0x10] sm:$0xff]  ;;  %v2296_v53 = vld [vmem:[#allocation2 + $0x40] sm:$0xff] }
 0x1e9   :  { %487 = vmatpush.msrb.mxu0 %v2277_v43  ;;  %432 = vmatpush.msrb.mxu1 %v2279_v44 }
 0x1ea   :  { %v315_v12 = vmul.f32 %v311_v8, %v311_v8  ;;  %v316_v13 = vmul.f32 %v312_v9, %v312_v9  ;;  %v317_v14 = vmul.f32 %v313_v10, %v313_v10  ;;  %v318_v15 = vmul.f32 %v2264_v11, %v2264_v11  ;;  %1909 = vmatpush.msra.mxu3 %v2279_v44 }
 0x1eb   :  { %488 = vmatpush.msrb.mxu0 %v2282_v46  ;;  %433 = vmatpush.msrb.mxu1 %v2285_v47 }
 0x1ec   :  { %v319_v16 = vsel %vm289_vm3, %v315_v12, 0.0  ;;  %v320_v17 = vsel %vm289_vm3, %v316_v13, 0.0  ;;  %v322_v19 = vsel %vm289_vm3, %v317_v14, 0.0  ;;  %v324_v21 = vsel %vm289_vm3, %v318_v15, 0.0  ;;  %1910 = vmatpush.msra.mxu3 %v2285_v47  ;;  %v2308_v12 = vld [vmem:[#allocation2 + $0x70] sm:$0xff]  ;;  %v2314_v13 = vld [vmem:[#allocation2 + $0x68] sm:$0xff] }
 0x1ed   :  { %v321_v18 = vadd.f32 %v320_v17, %v319_v16  ;;  %489 = vmatpush.msrb.mxu0 %v2289_v50  ;;  %434 = vmatpush.msrb.mxu1 %v2292_v51  ;;  %v2316_v14 = vld [vmem:[#allocation2 + $0x108] sm:$0xff]  ;;  %v2320_v15 = vld [vmem:[#allocation2 + $0x60] sm:$0xff]  ;;  %v2328_v17 = vld [vmem:[#allocation2 + $0x38] sm:$0xff] }
 0x1ee   :  { %1911 = vmatpush.msra.mxu3 %v2292_v51  ;;  %v2322_v16 = vld [vmem:[#allocation2 + $0x100] sm:$0xff] }
 0x1ef   :  { %v323_v20 = vadd.f32 %v322_v19, %v321_v18  ;;  %490 = vmatpush.msrb.mxu0 %v2296_v53  ;;  %v2330_v18 = vld [vmem:[#allocation2 + $0xb8] sm:$0xff]  ;;  %v2332_v19 = vld [vmem:[#allocation2 + $0x30] sm:$0xff] }
 0x1f0   :  { %459 = vmatpush.msrb.mxu3 %v2328_v17 }
 0x1f1   :  { %v325_v22 = vadd.f32 %v324_v21, %v323_v20  ;;  %571 = vmatpush.msra.mxu0 %v2330_v18  ;;  %v2336_v20 = vld [vmem:[#allocation2 + $0xb0] sm:$0xff]  ;;  %v2338_v21 = vld [vmem:[#allocation2 + $0x28] sm:$0xff] }
 0x1f2   :  { %460 = vmatpush.msrb.mxu3 %v2332_v19 }
 0x1f3   :  { %v326_v23 = vrot.slane %v325_v22, 4  ;;  %572 = vmatpush.msra.mxu0 %v2336_v20 }
 0x1f4   :  { %461 = vmatpush.msrb.mxu3 %v2338_v21 }
 0x1f5   :  { %v327_v24 = vadd.f32 %v326_v23, %v325_v22  ;;  %v2340_v22 = vld [vmem:[#allocation2 + $0xa8] sm:$0xff]  ;;  %v2344_v23 = vld [vmem:[#allocation2 + $0x20] sm:$0xff] }
 0x1f6   :  { %573 = vmatpush.msra.mxu0 %v2340_v22  ;;  %462 = vmatpush.msrb.mxu3 %v2344_v23 }
 0x1f7   :  { %v328_v25 = vrot.slane %v327_v24, 2 }
 0x1f9   :  { %v329_v26 = vadd.f32 %v328_v25, %v327_v24  ;;  %v2346_v24 = vld [vmem:[#allocation2 + $0xa0] sm:$0xff]  ;;  %v2352_v25 = vld [vmem:[#allocation2 + $0xd8] sm:$0xff] }
 0x1fa   :  { %574 = vmatpush.msra.mxu0 %v2346_v24 }
 0x1fb   :  { %v330_v27 = vrot.slane %v329_v26, 1 }
 0x1fd   :  { %v331_v28 = vadd.f32 %v330_v27, %v329_v26  ;;  %v2356_v27 = vld [vmem:[#allocation2 + $0xd0] sm:$0xff] }
 0x1ff   :  { %v332_v29 = vmul.f32 %v331_v28, %v2261_v5  ;;  %v2359_v28 = vld [vmem:[#allocation2 + $0xc8] sm:$0xff] }
 0x201   :  { %v333_v30 = vadd.f32 1e-05, %v332_v29  ;;  %v2362_v29 = vld [vmem:[#allocation2 + $0xc0] sm:$0xff] }
 0x203   :  { %1967 = vrsqrt.f32 %v333_v30  ;;  %vm340_vm6 = vweird.f32 %v333_v30 }
 0x209   :  { %v1968_v31 = vpop.eup %1967 }
 0x20a   :  { %v335_v32 = vmul.f32 %v1968_v31, %v333_v30  ;;  %vm341_vm5 = vweird.f32 %v1968_v31 }
 0x20b   :  { %vm342_vm7 = vmor %vm340_vm6, %vm341_vm5 }
 0x20c   :  { %v336_v33 = vmul.f32 %v1968_v31, %v335_v32  ;;  %v2372_v32 = vld [vmem:[#allocation2 + $0x90] sm:$0xff] }
 0x20e   :  { %v337_v34 = vmul.f32 0.5, %v336_v33  ;;  %v2376_v33 = vld [vmem:[#allocation2 + $0x88] sm:$0xff] }
 0x210   :  { %v338_v35 = vsub.f32 1.5, %v337_v34  ;;  %v2381_v34 = vld [vmem:[#allocation2 + $0x80] sm:$0xff] }
 0x212   :  { %v339_v36 = vmul.f32 %v1968_v31, %v338_v35  ;;  %v2384_v35 = vld [vmem:[#allocation2 + $0xf8] sm:$0xff] }
 0x214   :  { %v343_v38 = vsel %vm342_vm7, %v1968_v31, %v339_v36  ;;  %v2366_v31 = vld [vmem:[#allocation2 + $0x98] sm:$0xff]  ;;  %v2390_v36 = vld [vmem:[#allocation2 + $0xf0] sm:$0xff] }
 0x215   :  { %v344_v39 = vmul.f32 %v343_v38, %v311_v8  ;;  %v345_v41 = vmul.f32 %v343_v38, %v312_v9  ;;  %v346_v56 = vmul.f32 %v343_v38, %v313_v10  ;;  %v347_v59 = vmul.f32 %v343_v38, %v2264_v11  ;;  %v2304_v9 = vld [vmem:[#allocation2 + $0x78] sm:$0xff]  ;;  %v2312_v11 = vld [vmem:[#allocation2 + $0x110] sm:$0xff]  ;;  %v2398_v38 = vld [vmem:[#allocation2 + $0xe0] sm:$0xff] }
 0x216   :  { %v2306_v10 = vld [vmem:[#allocation2 + $0x118] sm:$0xff]  ;;  %515 = vmatpush.msra.mxu1 %v2304_v9 }
 0x217   :  { %v352_v45 = vmul.f32 %v1958_v37, %v344_v39  ;;  %v353_v49 = vmul.f32 %v1958_v37, %v345_v41  ;;  %v354_v58 = vmul.f32 %v1958_v37, %v346_v56  ;;  %v355_v62 = vmul.f32 %v1958_v37, %v347_v59  ;;  %1912 = vmatpush.msrb.mxu2 %v2306_v10  ;;  %v2394_v37 = vld [vmem:[#allocation2 + $0xe8] sm:$0xff]  ;;  %v923_v39 = vld [vmem:[%s2064_s9] sm:$0x3]  ;;  %s2735_s9 = sld [smem:[#allocation8_spill]] }
 0x218   :  { %516 = vmatpush.msra.mxu1 %v2308_v12  ;;  %v671_v59 = vld [vmem:[%s2114_s24 + $0x28] sm:$0xff] }
 0x219   :  { %v360_v48 = vadd.f32 %v1959_v40, %v352_v45  ;;  %v361_v55 = vadd.f32 %v1959_v40, %v353_v49  ;;  %v362_v61 = vadd.f32 %v1959_v40, %v354_v58  ;;  %v363_v6 = vadd.f32 %v1959_v40, %v355_v62  ;;  %1913 = vmatpush.msrb.mxu2 %v2312_v11  ;;  %v674_v62 = vld [vmem:[%s2119_s30] sm:$0xff] }
 0x21a   :  { %517 = vmatpush.msra.mxu1 %v2314_v13 }
 0x21b   :  { %vm364_vm8 = vcmp.gt.f32.partialorder %v360_v48, 0.0  ;;  %v368_v52 = vmul.f32 0.01, %v360_v48  ;;  %v369_v57 = vmul.f32 0.01, %v361_v55  ;;  %vm365_vm9 = vcmp.gt.f32.partialorder %v361_v55, 0.0  ;;  %1914 = vmatpush.msrb.mxu2 %v2316_v14 }
 0x21c   :  { %v370_v63 = vmul.f32 0.01, %v362_v61  ;;  %vm366_vm10 = vcmp.gt.f32.partialorder %v362_v61, 0.0  ;;  %v371_v7 = vmul.f32 0.01, %v363_v6  ;;  %vm367_vm11 = vcmp.gt.f32.partialorder %v363_v6, 0.0  ;;  %518 = vmatpush.msra.mxu1 %v2320_v15 }
 0x21d   :  { %v372_v54 = vsel %vm364_vm8, %v360_v48, %v368_v52  ;;  %v373_v60 = vsel %vm365_vm9, %v361_v55, %v369_v57  ;;  %1915 = vmatpush.msrb.mxu2 %v2322_v16  ;;  %v669_v57 = vld [vmem:[%s2114_s24 + $0x18] sm:$0xff] }
 0x21e   :  { %376 = vxpose.xlu0.b32.start [1/4] (short) (narrow) %v372_v54, 16  ;;  %v374_v0 = vsel %vm366_vm10, %v362_v61, %v370_v63  ;;  %v375_v8 = vsel %vm367_vm11, %v363_v6, %v371_v7  ;;  %v667_v54 = vld [vmem:[%s2114_s24 + $0x8] sm:$0xff]  ;;  %v673_v61 = vld [vmem:[%s2114_s24 + $0x38] sm:$0xff]  ;;  %v1020_v6 = vld [vmem:[%s2144_s4 + $0x70] sm:$0xff] }
 0x21f   :  { %v1021_v63 = vld [vmem:[%s2144_s4 + $0x78] sm:$0xff]  ;;  %v666_v7 = vld [vmem:[%s2114_s24] sm:$0xff] }
 0x226   :  { %377 = vxpose.xlu0.b32.cont [2/4] (short) (narrow) %v373_v60, 16 }
 0x22e   :  { %378 = vxpose.xlu0.b32.cont [3/4] (short) (narrow) %v374_v0, 16  ;;  %v2049_v0 = vmov 0  }
 0x22f   :  { %1954 = vset.pattern.permute.xlu2 %v2049_v0 }
 0x230   :  { %680 = vperm.xlu2 %1954, %v674_v62  }
 0x236   :  { %379 = vxpose.xlu0.b32.end [4/4] (short) (narrow) %v375_v8, 16  ;;  %v1019_v8 = vld [vmem:[%s2144_s4 + $0x68] sm:$0xff] }
 0x29d   :  { %1956 = vset.pattern.permute.xlu0 %v2049_v0 }
 0x2c2   :  { %v392_v26 = vpop.trf.xlu0 }
 0x2c3   :  { %1845 = vmatmul.msk.f32.vlgmr.msrb.gmra.mxu1 %vm412_vm12, %v392_v26  ;;  %1849 = vmatmul.msk.f32.vlgmr.msrb.gmra.mxu0 %vm412_vm12, %v392_v26 }
 0x2c4   :  { %599 = vmatpush.msrb.mxu1 %v2352_v25 }
 0x2c6   :  { %600 = vmatpush.msrb.mxu1 %v2356_v27 }
 0x2c8   :  { %601 = vmatpush.msrb.mxu1 %v2359_v28 }
 0x2ca   :  { %v393_v30 = vpop.trf.xlu0  ;;  %602 = vmatpush.msrb.mxu1 %v2362_v29 }
 0x2cb   :  { %1846 = vmatmul.msk.f32.vlgmr.msra.gmra.mxu3 %vm412_vm12, %v393_v30  ;;  %1850 = vmatmul.msk.f32.gmra.mxu0 %vm412_vm12, %v393_v30 }
 0x2cc   :  { %1851 = vmatmul.msk.f32.vlgmr.msra.gmra.mxu1 %vm412_vm12, %v392_v26  ;;  %1862 = vmatmul.msk.f32.vlgmr.msrb.gmra.mxu2 %vm412_vm12, %v393_v30 }
 0x2cd   :  { %543 = vmatpush.msra.mxu3 %v2366_v31  ;;  %655 = vmatpush.msra.mxu1 %v2306_v10 }
 0x2cf   :  { %544 = vmatpush.msra.mxu3 %v2372_v32  ;;  %656 = vmatpush.msra.mxu1 %v2312_v11 }
 0x2d1   :  { %545 = vmatpush.msra.mxu3 %v2376_v33  ;;  %657 = vmatpush.msra.mxu1 %v2316_v14 }
 0x2d3   :  { %1847 = vmatmul.msk.f32.vlgmr.msrb.gmra.mxu3 %vm412_vm12, %v392_v26  ;;  %1855 = vmatmul.msk.f32.vlgmr.msra.gmra.mxu0 %vm412_vm12, %v392_v26 }
 0x2d4   :  { %1852 = vmatmul.msk.f32.gmra.mxu1 %vm412_vm12, %v393_v30  ;;  %546 = vmatpush.msra.mxu3 %v2381_v34 }
 0x2d5   :  { %658 = vmatpush.msra.mxu1 %v2322_v16 }
 0x2d6   :  { %627 = vmatpush.msrb.mxu3 %v2384_v35 }
 0x2d8   :  { %628 = vmatpush.msrb.mxu3 %v2390_v36 }
 0x2da   :  { %629 = vmatpush.msrb.mxu3 %v2394_v37 }
 0x2db   :  { %1848 = vmatmul.msk.f32.gmra.mxu3 %vm412_vm12, %v393_v30  ;;  %1856 = vmatmul.msk.f32.gmra.mxu0 %vm412_vm12, %v393_v30 }
 0x2dc   :  { %1857 = vmatmul.msk.f32.vlgmr.msrb.gmra.mxu1 %vm412_vm12, %v392_v26  ;;  %630 = vmatpush.msrb.mxu3 %v2398_v38 }
 0x2e3   :  { %1853 = vmatmul.msk.f32.vlgmr.msra.gmra.mxu3 %vm412_vm12, %v392_v26 }
 0x2e4   :  { %1858 = vmatmul.msk.f32.gmra.mxu1 %vm412_vm12, %v393_v30  ;;  %1867 = vmatpush.msk.msra.mxu3 %vm156_vm0, %v923_v39  ;;  %v1009_v39 = vld [vmem:[%s2144_s4 + $0x18] sm:$0xff] }
 0x2eb   :  { %1854 = vmatmul.msk.f32.gmra.mxu3 %vm412_vm12, %v393_v30 }
 0x2ec   :  { %1861 = vmatmul.msk.f32.vlgmr.msra.gmra.mxu1 %vm412_vm12, %v392_v26 }
 0x2f3   :  { %1859 = vmatmul.msk.f32.vlgmr.msrb.gmra.mxu3 %vm412_vm12, %v392_v26  ;;  %v1016_v26 = vld [vmem:[%s2144_s4 + $0x50] sm:$0xff] }
 0x2f4   :  { %1181 = vmatpush.msrb.mxu3 %v2275_v42 }
 0x2f6   :  { %1182 = vmatpush.msrb.mxu3 %v2279_v44 }
 0x2f8   :  { %1183 = vmatpush.msrb.mxu3 %v2285_v47 }
 0x2fa   :  { %1184 = vmatpush.msrb.mxu3 %v2292_v51 }
 0x2fb   :  { %1860 = vmatmul.msk.f32.gmra.mxu3 %vm412_vm12, %v393_v30  ;;  %v668_v30 = vld [vmem:[%s2114_s24 + $0x10] sm:$0xff] }
 0x303   :  { %1868 = vmatmul.msk.f32.vlgmr.msra.gmra.mxu3 %vm143_vm1, %v2211_v1 }
 0x304   :  { %1221 = vmatpush.msra.mxu3 %v2277_v43 }
 0x306   :  { %1222 = vmatpush.msra.mxu3 %v2282_v46 }
 0x308   :  { %1223 = vmatpush.msra.mxu3 %v2289_v50 }
 0x30a   :  { %1224 = vmatpush.msra.mxu3 %v2296_v53 }
 0x30b   :  { %1869 = vmatmul.msk.f32.gmra.mxu3 %vm143_vm1, %v2217_v2  ;;  %v956_v2 = vld [vmem:[%s2134_s20] sm:$0xff] }
 0x30c   :  { %984 = vmatpush.msra.mxu2 %v956_v2 }
 0x30e   :  { %1201 = vmatpush.msrb.mxu2 %v2328_v17  ;;  %v1018_v17 = vld [vmem:[%s2144_s4 + $0x60] sm:$0xff] }
 0x310   :  { %1202 = vmatpush.msrb.mxu2 %v2332_v19 }
 0x312   :  { %1203 = vmatpush.msrb.mxu2 %v2338_v21  ;;  %v675_v21 = vld [vmem:[%s2119_s30 + $0x8] sm:$0xff] }
 0x313   :  { %1870 = vmatmul.msk.f32.gmra.mxu3 %vm143_vm1, %v2222_v3  ;;  %685 = vperm.xlu2 %1954, %v675_v21   ;;  %v2050_v21 = vmov 128.0  }
 0x314   :  { %1204 = vmatpush.msrb.mxu2 %v2344_v23  ;;  %v1017_v23 = vld [vmem:[%s2144_s4 + $0x58] sm:$0xff]  ;;  %1969 = vrcp.f32 %v2050_v21 }
 0x31b   :  { %1871 = vmatmul.msk.f32.gmra.mxu3 %vm143_vm1, %v2227_v4 }
 0x340   :  { %v2428_v40 = vpop.f32.mrf.mxu1  ;;  %v492_v3 = vpop.f32.mrf.mxu0 }
 0x348   :  { %v495_v50 = vpop.f32.mrf.mxu0 }
 0x349   :  { %v520_v1 = vpop.f32.mrf.mxu1 }
 0x34e   :  { %v2430_v41 = vpop.f32.mrf.mxu3 }
 0x34f   :  { %v663_v42 = vpop.f32.mrf.mxu2 }
 0x350   :  { %753 = vmatpush.msrb.mxu1 %v663_v42  ;;  %v576_v52 = vpop.f32.mrf.mxu0 }
 0x351   :  { %v523_v43 = vpop.f32.mrf.mxu1 }
 0x356   :  { %v464_v44 = vpop.f32.mrf.mxu3 }
 0x358   :  { %v579_v55 = vpop.f32.mrf.mxu0 }
 0x359   :  { %v604_v45 = vpop.f32.mrf.mxu1 }
 0x35e   :  { %v467_v46 = vpop.f32.mrf.mxu3 }
 0x361   :  { %v607_v47 = vpop.f32.mrf.mxu1 }
 0x366   :  { %v548_v48 = vpop.f32.mrf.mxu3 }
 0x369   :  { %v660_v4 = vpop.f32.mrf.mxu1 }
 0x36a   :  { %754 = vmatpush.msrb.mxu1 %v660_v4 }
 0x36b   :  { %1863 = vmatmul.msk.f32.vlgmr.msrb.gmra.mxu1 %vm289_vm3, %v667_v54 }
 0x36c   :  { %1026 = vmatpush.msra.mxu1 %v1021_v63 }
 0x36e   :  { %v551_v49 = vpop.f32.mrf.mxu3  ;;  %1027 = vmatpush.msra.mxu1 %v1020_v6 }
 0x370   :  { %1028 = vmatpush.msra.mxu1 %v1019_v8 }
 0x372   :  { %1029 = vmatpush.msra.mxu1 %v1018_v17 }
 0x373   :  { %1864 = vmatmul.msk.f32.gmra.mxu1 %vm289_vm3, %v669_v57 }
 0x374   :  { %1030 = vmatpush.msra.mxu1 %v1017_v23  ;;  %v1970_v23 = vpop.eup %1969 }
 0x375   :  { %vm781_vm13 = vweird.f32 %v1970_v23 }
 0x376   :  { %v632_v51 = vpop.f32.mrf.mxu3  ;;  %1031 = vmatpush.msra.mxu1 %v1016_v26  ;;  %v777_v26 = vmul.f32 128.0, %v1970_v23 }
 0x37b   :  { %1865 = vmatmul.msk.f32.gmra.mxu1 %vm289_vm3, %v671_v59 }
 0x37e   :  { %v635_v53 = vpop.f32.mrf.mxu3 }
 0x37f   :  { %710 = vmatpush.msrb.mxu0 %v635_v53  ;;  %v1001_v53 = vld [vmem:[%s2735_s9 + $0x18] sm:$0xff] }
 0x381   :  { %711 = vmatpush.msrb.mxu0 %v632_v51 }
 0x383   :  { %712 = vmatpush.msrb.mxu0 %v607_v47  ;;  %1866 = vmatmul.msk.f32.gmra.mxu1 %vm289_vm3, %v673_v61 }
 0x385   :  { %713 = vmatpush.msrb.mxu0 %v604_v45 }
 0x386   :  { %v944_v56 = vpop.f32.mrf.mxu3 }
 0x387   :  { %714 = vmatpush.msrb.mxu0 %v579_v55  ;;  %1872 = vmatmul.msk.f32.vlgmr.msra.gmra.mxu2 %vm190_vm2, %v944_v56 }
 0x388   :  { %1261 = vmatpush.msra.mxu2 %v2366_v31  ;;  %v1015_v31 = vld [vmem:[%s2144_s4 + $0x48] sm:$0xff] }
 0x389   :  { %715 = vmatpush.msrb.mxu0 %v576_v52  ;;  %1032 = vmatpush.msra.mxu1 %v1015_v31 }
 0x38a   :  { %1262 = vmatpush.msra.mxu2 %v2372_v32  ;;  %v1014_v32 = vld [vmem:[%s2144_s4 + $0x40] sm:$0xff] }
 0x38b   :  { %716 = vmatpush.msrb.mxu0 %v551_v49  ;;  %1033 = vmatpush.msra.mxu1 %v1014_v32 }
 0x38c   :  { %1263 = vmatpush.msra.mxu2 %v2376_v33  ;;  %v1013_v33 = vld [vmem:[%s2144_s4 + $0x38] sm:$0xff] }
 0x38d   :  { %717 = vmatpush.msrb.mxu0 %v548_v48  ;;  %1034 = vmatpush.msra.mxu1 %v1013_v33  ;;  %v1000_v48 = vld [vmem:[%s2735_s9 + $0x10] sm:$0xff] }
 0x38e   :  { %v947_v58 = vpop.f32.mrf.mxu3  ;;  %1264 = vmatpush.msra.mxu2 %v2381_v34  ;;  %v1011_v34 = vld [vmem:[%s2144_s4 + $0x28] sm:$0xff] }
 0x38f   :  { %718 = vmatpush.msrb.mxu0 %v523_v43  ;;  %1873 = vmatmul.msk.f32.gmra.mxu2 %vm190_vm2, %v947_v58  ;;  %v999_v43 = vld [vmem:[%s2735_s9 + $0x8] sm:$0xff] }
 0x391   :  { %719 = vmatpush.msrb.mxu0 %v520_v1  ;;  %v1006_v1 = vld [vmem:[%s2144_s4] sm:$0xff] }
 0x393   :  { %720 = vmatpush.msrb.mxu0 %v495_v50 }
 0x395   :  { %721 = vmatpush.msrb.mxu0 %v492_v3 }
 0x396   :  { %v950_v60 = vpop.f32.mrf.mxu3 }
 0x397   :  { %722 = vmatpush.msrb.mxu0 %v467_v46  ;;  %1874 = vmatmul.msk.f32.gmra.mxu2 %vm190_vm2, %v950_v60  ;;  %v681_v46 = vpop.permute.xlu2 %680 }
 0x399   :  { %723 = vmatpush.msrb.mxu0 %v464_v44 }
 0x39b   :  { %724 = vmatpush.msrb.mxu0 %v2430_v41  ;;  %v998_v41 = vld [vmem:[%s2735_s9] sm:$0xff] }
 0x39d   :  { %725 = vmatpush.msrb.mxu0 %v2428_v40  ;;  %v672_v40 = vld [vmem:[%s2114_s24 + $0x30] sm:$0xff] }
 0x39e   :  { %726 = vmatmul.f32.vlgmr.msrb.gmra.mxu0 %v666_v7  ;;  %v953_v19 = vpop.f32.mrf.mxu3 }
 0x39f   :  { %1875 = vmatmul.msk.f32.gmra.mxu2 %vm190_vm2, %v953_v19  ;;  %1241 = vmatpush.msra.mxu0 %v2304_v9  ;;  %v676_v9 = vld [vmem:[%s2119_s30 + $0x10] sm:$0xff]  ;;  %v686_v50 = vpop.permute.xlu2 %685 }
 0x3a0   :  { %690 = vperm.xlu2 %1954, %v676_v9  }
 0x3a1   :  { %1242 = vmatpush.msra.mxu0 %v2308_v12  ;;  %v1012_v12 = vld [vmem:[%s2144_s4 + $0x30] sm:$0xff] }
 0x3a2   :  { %1035 = vmatpush.msra.mxu1 %v1012_v12 }
 0x3a3   :  { %1243 = vmatpush.msra.mxu0 %v2314_v13  ;;  %v670_v13 = vld [vmem:[%s2114_s24 + $0x20] sm:$0xff]  ;;  %s2746_s24 = sld [smem:[#allocation15_spill]] }
 0x3a4   :  { %1036 = vmatpush.msra.mxu1 %v1011_v34 }
 0x3a5   :  { %1244 = vmatpush.msra.mxu0 %v2320_v15  ;;  %v1010_v15 = vld [vmem:[%s2144_s4 + $0x20] sm:$0xff] }
 0x3a6   :  { %729 = vmatmul.f32.gmra.mxu0 %v668_v30  ;;  %1037 = vmatpush.msra.mxu1 %v1010_v15  ;;  %v778_v30 = vsub.f32 1.0, %v777_v26 }
 0x3a7   :  { %1301 = vmatpush.msrb.mxu0 %v2352_v25  ;;  %v677_v25 = vld [vmem:[%s2119_s30 + $0x18] sm:$0xff] }
 0x3a8   :  { %695 = vperm.xlu2 %1954, %v677_v25   ;;  %1038 = vmatpush.msra.mxu1 %v1009_v39  ;;  %v779_v31 = vmul.f32 %v1970_v23, %v778_v30  ;;  %v1960_v39 = vld [vmem:[%s2736_s13] ss:$0 sm:$0xff] }
 0x3a9   :  { %1302 = vmatpush.msrb.mxu0 %v2356_v27  ;;  %v1008_v27 = vld [vmem:[%s2144_s4 + $0x10] sm:$0xff] }
 0x3aa   :  { %1039 = vmatpush.msra.mxu1 %v1008_v27  ;;  %v780_v9 = vadd.f32 %v1970_v23, %v779_v31 }
 0x3ab   :  { %1303 = vmatpush.msrb.mxu0 %v2359_v28  ;;  %v1007_v28 = vld [vmem:[%s2144_s4 + $0x8] sm:$0xff] }
 0x3ac   :  { %1040 = vmatpush.msra.mxu1 %v1007_v28  ;;  %v2501_v33 = vsel %vm781_vm13, %v1970_v23, %v780_v9 }
 0x3ad   :  { %1304 = vmatpush.msrb.mxu0 %v2362_v29 }
 0x3ae   :  { %732 = vmatmul.f32.gmra.mxu0 %v670_v13  ;;  %1041 = vmatpush.msra.mxu1 %v1006_v1 }
 0x3b6   :  { %735 = vmatmul.f32.gmra.mxu0 %v672_v40 }
 0x3e8   :  { %v756_v47 = vpop.f32.mrf.mxu1 }
 0x3f0   :  { %v759_v52 = vpop.f32.mrf.mxu1 }
 0x3f8   :  { %v762_v60 = vpop.f32.mrf.mxu1 }
 0x3fa   :  { %v691_v59 = vpop.permute.xlu2 %690 }
 0x400   :  { %v765_v8 = vpop.f32.mrf.mxu1 }
 0x402   :  { %v696_v6 = vpop.permute.xlu2 %695 }
 0x40a   :  { %v986_v29 = vpop.f32.mrf.mxu2 }
 0x40b   :  { %v1002_v42 = vmul.f32 %v998_v41, %v986_v29 }
 0x40d   :  { %1042 = vmatmul.f32.vlgmr.msra.gmra.mxu1 %v1002_v42 }
 0x412   :  { %v989_v44 = vpop.f32.mrf.mxu2 }
 0x413   :  { %v1003_v45 = vmul.f32 %v999_v43, %v989_v44 }
 0x415   :  { %1045 = vmatmul.f32.gmra.mxu1 %v1003_v45 }
 0x41a   :  { %v992_v2 = vpop.f32.mrf.mxu2 }
 0x41b   :  { %v1004_v3 = vmul.f32 %v1000_v48, %v992_v2  ;;  %v727_v4 = vpop.f32.mrf.mxu0 }
 0x41c   :  { %v728_v49 = vadd.f32 %v727_v4, %v681_v46 }
 0x41d   :  { %1048 = vmatmul.f32.gmra.mxu1 %v1004_v3 }
 0x41e   :  { %v757_v51 = vadd.f32 %v756_v47, %v728_v49 }
 0x420   :  { %768 = vadd.xlane.f32.xlu0 %v757_v51 }
 0x422   :  { %v995_v54 = vpop.f32.mrf.mxu2 }
 0x423   :  { %v1005_v55 = vmul.f32 %v1001_v53, %v995_v54  ;;  %v730_v56 = vpop.f32.mrf.mxu0 }
 0x424   :  { %v731_v57 = vadd.f32 %v730_v56, %v686_v50 }
 0x425   :  { %1051 = vmatmul.f32.gmra.mxu1 %v1005_v55 }
 0x426   :  { %v2493_v58 = vadd.f32 %v759_v52, %v731_v57 }
 0x42b   :  { %v733_v61 = vpop.f32.mrf.mxu0 }
 0x42c   :  { %v734_v62 = vadd.f32 %v733_v61, %v691_v59 }
 0x42e   :  { %v2495_v63 = vadd.f32 %v762_v60, %v734_v62 }
 0x430   :  { %772 = vadd.xlane.f32.xlu2 %v2495_v63 }
 0x433   :  { %v736_v7 = vpop.f32.mrf.mxu0 }
 0x434   :  { %v737_v17 = vadd.f32 %v736_v7, %v696_v6 }
 0x436   :  { %v2498_v19 = vadd.f32 %v765_v8, %v737_v17 }
 0x438   :  { %774 = vadd.xlane.f32.xlu2 %v2498_v19 }
 0x48a   :  { %v1043_v32 = vpop.f32.mrf.mxu1 }
 0x48b   :  { %v1044_v28 = vadd.f32 %v1960_v39, %v1043_v32 }
 0x48d   :  { %v1055_v29 = vsel %vm190_vm2, %v1044_v28, 0.0 }
 0x492   :  { %v1046_v12 = vpop.f32.mrf.mxu1 }
 0x493   :  { %v769_v13 = vpop.xlane.xlu0 %768  ;;  %v1047_v40 = vadd.f32 %v1960_v39, %v1046_v12 }
 0x494   :  { %v783_v34 = vmul.f32 %v2501_v33, %v769_v13 }
 0x495   :  { %v1056_v41 = vsel %vm190_vm2, %v1047_v40, 0.0 }
 0x496   :  { %v2504_v15 = vsub.f32 %v757_v51, %v783_v34  ;;  %v1057_v43 = vadd.f32 %v1056_v41, %v1055_v29  ;;  %v1961_v41 = vld [vmem:[%s2737_s21] ss:$0 sm:$0xff] }
 0x498   :  { %v791_v25 = vmul.f32 %v2504_v15, %v2504_v15 }
 0x49a   :  { %v1049_v27 = vpop.f32.mrf.mxu1  ;;  %795 = vadd.xlane.f32.xlu2 %v791_v25 }
 0x49b   :  { %v1050_v1 = vadd.f32 %v1960_v39, %v1049_v27 }
 0x49d   :  { %v1058_v42 = vsel %vm190_vm2, %v1050_v1, 0.0 }
 0x49e   :  { %v1059_v46 = vadd.f32 %v1058_v42, %v1057_v43  ;;  %v1962_v43 = vld [vmem:[%s2738_s25] ss:$0 sm:$0xff] }
 0x4a2   :  { %v1052_v44 = vpop.f32.mrf.mxu1 }
 0x4a3   :  { %v1053_v45 = vadd.f32 %v1960_v39, %v1052_v44 }
 0x4a5   :  { %v1060_v47 = vsel %vm190_vm2, %v1053_v45, 0.0 }
 0x4a6   :  { %v1061_v48 = vadd.f32 %v1060_v47, %v1059_v46 }
 0x4a8   :  { %v1062_v2 = vrot.slane %v1061_v48, 4 }
 0x4aa   :  { %v1063_v3 = vadd.f32 %v1062_v2, %v1061_v48 }
 0x4ac   :  { %v1064_v4 = vrot.slane %v1063_v3, 2 }
 0x4ae   :  { %v1065_v49 = vadd.f32 %v1064_v4, %v1063_v3 }
 0x4b0   :  { %v1066_v50 = vrot.slane %v1065_v49, 1 }
 0x4b2   :  { %v1067_v51 = vadd.f32 %v1066_v50, %v1065_v49 }
 0x4b4   :  { %v1068_v52 = vmul.f32 %v1067_v51, %v2261_v5 }
 0x4b6   :  { %v1069_v53 = vsub.f32 %v1044_v28, %v1068_v52  ;;  %v1070_v54 = vsub.f32 %v1047_v40, %v1068_v52  ;;  %v1071_v55 = vsub.f32 %v1050_v1, %v1068_v52  ;;  %v1072_v56 = vsub.f32 %v1053_v45, %v1068_v52 }
 0x4b8   :  { %v1073_v57 = vmul.f32 %v1069_v53, %v1069_v53  ;;  %v1074_v59 = vmul.f32 %v1070_v54, %v1070_v54  ;;  %v1075_v60 = vmul.f32 %v1071_v55, %v1071_v55  ;;  %v1076_v61 = vmul.f32 %v1072_v56, %v1072_v56 }
 0x4ba   :  { %v1077_v62 = vsel %vm190_vm2, %v1073_v57, 0.0  ;;  %v1078_v6 = vsel %vm190_vm2, %v1074_v59, 0.0  ;;  %v1080_v8 = vsel %vm190_vm2, %v1075_v60, 0.0  ;;  %v1082_v21 = vsel %vm190_vm2, %v1076_v61, 0.0 }
 0x4bb   :  { %v1079_v7 = vadd.f32 %v1078_v6, %v1077_v62  ;;  %v886_v62 = vld [vmem:[%s2741_s8 + $0x18] sm:$0xff] }
 0x4bd   :  { %v1081_v17 = vadd.f32 %v1080_v8, %v1079_v7  ;;  %v855_v7 = vld [vmem:[%s2740_s3] sm:$0xff] }
 0x4bf   :  { %v1083_v23 = vadd.f32 %v1082_v21, %v1081_v17  ;;  %v857_v17 = vld [vmem:[%s2740_s3 + $0x10] sm:$0xff] }
 0x4c1   :  { %v1084_v26 = vrot.slane %v1083_v23, 4 }
 0x4c3   :  { %v1085_v30 = vadd.f32 %v1084_v26, %v1083_v23  ;;  %v883_v23 = vld [vmem:[%s2741_s8] sm:$0xff] }
 0x4c5   :  { %v1086_v31 = vrot.slane %v1085_v30, 2 }
 0x4c7   :  { %v1087_v32 = vadd.f32 %v1086_v31, %v1085_v30  ;;  %v885_v31 = vld [vmem:[%s2741_s8 + $0x10] sm:$0xff] }
 0x4c9   :  { %v1088_v9 = vrot.slane %v1087_v32, 1 }
 0x4cb   :  { %v1089_v12 = vadd.f32 %v1088_v9, %v1087_v32 }
 0x4cd   :  { %v1090_v13 = vmul.f32 %v1089_v12, %v2261_v5 }
 0x4cf   :  { %v1091_v34 = vadd.f32 1e-05, %v1090_v13 }
 0x4d1   :  { %1971 = vrsqrt.f32 %v1091_v34  ;;  %vm1098_vm15 = vweird.f32 %v1091_v34 }
 0x4d7   :  { %v1972_v25 = vpop.eup %1971 }
 0x4d8   :  { %v1093_v39 = vmul.f32 %v1972_v25, %v1091_v34  ;;  %vm1099_vm14 = vweird.f32 %v1972_v25 }
 0x4d9   :  { %vm1100_vm3 = vmor %vm1098_vm15, %vm1099_vm14 }
 0x4da   :  { %v1094_v27 = vmul.f32 %v1972_v25, %v1093_v39 }
 0x4dc   :  { %v1095_v40 = vmul.f32 0.5, %v1094_v27 }
 0x4de   :  { %v1096_v28 = vsub.f32 1.5, %v1095_v40 }
 0x4e0   :  { %v1097_v1 = vmul.f32 %v1972_v25, %v1096_v28  ;;  %v1349_v28 = vld [vmem:[%s2744_s19] sm:$0xff] }
 0x4e2   :  { %v1101_v29 = vsel %vm1100_vm3, %v1972_v25, %v1097_v1  ;;  %v1598_v1 = vld [vmem:[%s2194_s12 + $0x18] sm:$0xff] }
 0x4e3   :  { %v1102_v42 = vmul.f32 %v1101_v29, %v1069_v53  ;;  %v1103_v44 = vmul.f32 %v1101_v29, %v1070_v54  ;;  %v1104_v3 = vmul.f32 %v1101_v29, %v1071_v55  ;;  %v1105_v50 = vmul.f32 %v1101_v29, %v1072_v56  ;;  %v858_v56 = vld [vmem:[%s2740_s3 + $0x18] sm:$0xff]  ;;  %v1597_v29 = vld [vmem:[%s2194_s12 + $0x10] sm:$0xff] }
 0x4e4   :  { %876 = vperm.xlu0 %1956, %v858_v56  }
 0x4e5   :  { %v1110_v45 = vmul.f32 %v1961_v41, %v1102_v42  ;;  %v1111_v47 = vmul.f32 %v1961_v41, %v1103_v44  ;;  %v1112_v49 = vmul.f32 %v1961_v41, %v1104_v3  ;;  %v1113_v57 = vmul.f32 %v1961_v41, %v1105_v50  ;;  %v1963_v41 = vld [vmem:[%s2189_s17] ss:$0 sm:$0xff]  ;;  %v1596_v44 = vld [vmem:[%s2194_s12 + $0x8] sm:$0xff]  ;;  %v1352_v50 = vld [vmem:[%s2744_s19 + $0x18] sm:$0xff]  ;;  %s2745_s17 = sld [smem:[#allocation5_spill]] }
 0x4e7   :  { %v1118_v46 = vadd.f32 %v1962_v43, %v1110_v45  ;;  %v1119_v2 = vadd.f32 %v1962_v43, %v1111_v47  ;;  %v1120_v52 = vadd.f32 %v1962_v43, %v1112_v49  ;;  %v1121_v59 = vadd.f32 %v1962_v43, %v1113_v57  ;;  %v1350_v45 = vld [vmem:[%s2744_s19 + $0x8] sm:$0xff]  ;;  %v1595_v47 = vld [vmem:[%s2194_s12] sm:$0xff] }
 0x4e9   :  { %vm1122_vm4 = vcmp.gt.f32.partialorder %v1118_v46, 0.0  ;;  %v1126_v5 = vmul.f32 0.01, %v1118_v46  ;;  %v1127_v4 = vmul.f32 0.01, %v1119_v2  ;;  %vm1123_vm5 = vcmp.gt.f32.partialorder %v1119_v2, 0.0 }
 0x4ea   :  { %v1128_v53 = vmul.f32 0.01, %v1120_v52  ;;  %vm1124_vm6 = vcmp.gt.f32.partialorder %v1120_v52, 0.0  ;;  %v1129_v60 = vmul.f32 0.01, %v1121_v59  ;;  %vm1125_vm7 = vcmp.gt.f32.partialorder %v1121_v59, 0.0 }
 0x4eb   :  { %v1130_v48 = vsel %vm1122_vm4, %v1118_v46, %v1126_v5  ;;  %v1131_v51 = vsel %vm1123_vm5, %v1119_v2, %v1127_v4 }
 0x4ec   :  { %1134 = vxpose.xlu1.b32.start [1/4] (short) (narrow) %v1130_v48, 8  ;;  %v1132_v54 = vsel %vm1124_vm6, %v1120_v52, %v1128_v53  ;;  %v1133_v61 = vsel %vm1125_vm7, %v1121_v59, %v1129_v60  ;;  %v1351_v48 = vld [vmem:[%s2744_s19 + $0x10] sm:$0xff] }
 0x4f4   :  { %1135 = vxpose.xlu1.b32.cont [2/4] (short) (narrow) %v1131_v51, 8 }
 0x4fc   :  { %1136 = vxpose.xlu1.b32.cont [3/4] (short) (narrow) %v1132_v54, 8 }
 0x504   :  { %1137 = vxpose.xlu1.b32.end [4/4] (short) (narrow) %v1133_v61, 8 }
 0x557   :  { %1955 = vset.pattern.permute.xlu1 %v2049_v0 }
 0x564   :  { %770 = vadd.xlane.f32.xlu1 %v2493_v58 }
 0x590   :  { %v1150_v55 = vpop.trf.xlu1 }
 0x591   :  { %1876 = vmatmul.msk.f32.vlgmr.msrb.gmra.mxu3 %vm412_vm12, %v1150_v55  ;;  %1877 = vmatmul.msk.f32.vlgmr.msrb.gmra.mxu2 %vm412_vm12, %v1150_v55 }
 0x592   :  { %1879 = vmatmul.msk.f32.vlgmr.msra.gmra.mxu0 %vm412_vm12, %v1150_v55  ;;  %1281 = vmatpush.msrb.mxu3 %v2330_v18  ;;  %v1567_v18 = vld [vmem:[%s2739_s29] sm:$0xff] }
 0x593   :  { %1321 = vmatpush.msrb.mxu2 %v2384_v35  ;;  %1589 = vmatpush.msra.mxu0 %v1567_v18 }
 0x594   :  { %1282 = vmatpush.msrb.mxu3 %v2336_v20  ;;  %v1989_v20 = vld [vmem:[%s2059_s5] sm:$0x3]  ;;  %s2742_s5 = sld [smem:[#allocation13_spill]] }
 0x595   :  { %1322 = vmatpush.msrb.mxu2 %v2390_v36 }
 0x596   :  { %1283 = vmatpush.msrb.mxu3 %v2340_v22  ;;  %v856_v22 = vld [vmem:[%s2740_s3 + $0x8] sm:$0xff] }
 0x597   :  { %1323 = vmatpush.msrb.mxu2 %v2394_v37  ;;  %866 = vperm.xlu1 %1955, %v856_v22  }
 0x598   :  { %1284 = vmatpush.msrb.mxu3 %v2346_v24 }
 0x599   :  { %1878 = vmatmul.msk.f32.vlgmr.msra.gmra.mxu3 %vm412_vm12, %v1150_v55  ;;  %1880 = vmatmul.msk.f32.vlgmr.msra.gmra.mxu2 %vm412_vm12, %v1150_v55 }
 0x59a   :  { %1882 = vmatmul.msk.f32.vlgmr.msrb.gmra.mxu0 %vm412_vm12, %v1150_v55  ;;  %1324 = vmatpush.msrb.mxu2 %v2398_v38  ;;  %v1354_v8 = vld [vmem:[%s2742_s5 + $0x8] sm:$0xff]  ;;  %v1356_v21 = vld [vmem:[%s2742_s5 + $0x18] sm:$0xff]  ;;  %v1353_v9 = vld [vmem:[%s2742_s5] sm:$0xff] }
 0x59b   :  { %1341 = vmatpush.msra.mxu3 %v2306_v10  ;;  %v884_v10 = vld [vmem:[%s2741_s8 + $0x8] sm:$0xff]  ;;  %v1355_v25 = vld [vmem:[%s2742_s5 + $0x10] sm:$0xff] }
 0x59c   :  { %1618 = vmatpush.msra.mxu2 %v1598_v1 }
 0x59d   :  { %1342 = vmatpush.msra.mxu3 %v2312_v11  ;;  %v773_v11 = vpop.xlane.xlu2 %772 }
 0x59e   :  { %1619 = vmatpush.msra.mxu2 %v1597_v29  ;;  %v877_v29 = vpop.permute.xlu0 %876 }
 0x59f   :  { %1343 = vmatpush.msra.mxu3 %v2316_v14  ;;  %894 = vperm.xlu1 %1955, %v884_v10  }
 0x5a0   :  { %1620 = vmatpush.msra.mxu2 %v1596_v44 }
 0x5a1   :  { %1881 = vmatmul.msk.f32.vlgmr.msrb.gmra.mxu3 %vm412_vm12, %v1150_v55  ;;  %1883 = vmatmul.msk.f32.vlgmr.msrb.gmra.mxu2 %vm412_vm12, %v1150_v55 }
 0x5a2   :  { %1344 = vmatpush.msra.mxu3 %v2322_v16  ;;  %1889 = vmatmul.msk.f32.vlgmr.msra.gmra.mxu0 %vm190_vm2, %v1989_v20  ;;  %v785_v16 = vmul.f32 %v2501_v33, %v773_v11  ;;  %vm1377_vm2 = vcmask 588800  }
 0x5a3   :  { %1621 = vmatpush.msra.mxu2 %v1595_v47 }
 0x5a4   :  { %v2557_v37 = vsub.f32 %v2495_v63, %v785_v16 }
 0x5a5   :  { %v775_v38 = vpop.xlane.xlu2 %774 }
 0x5a6   :  { %v786_v0 = vmul.f32 %v2501_v33, %v775_v38 }
 0x5a7   :  { %904 = vperm.xlu1 %1955, %v886_v62  }
 0x5a8   :  { %v2565_v6 = vsub.f32 %v2498_v19, %v786_v0  ;;  %v1500_v19 = vld [vmem:[%s2743_s14 + $0x8] sm:$0xff] }
 0x5a9   :  { %1884 = vmatmul.msk.f32.vlgmr.msra.gmra.mxu3 %vm412_vm12, %v1150_v55 }
 0x5aa   :  { %v794_v63 = vmul.f32 %v2565_v6, %v2565_v6 }
 0x5ad   :  { %v796_v5 = vpop.xlane.xlu2 %795 }
 0x5ae   :  { %v803_v2 = vmul.f32 %v796_v5, %v2501_v33 }
 0x5af   :  { %1364 = vperm.xlu1 %1955, %v1354_v8  }
 0x5b0   :  { %v807_v3 = vadd.f32 1e-05, %v803_v2 }
 0x5b2   :  { %1973 = vrsqrt.f32 %v807_v3  ;;  %vm817_vm15 = vweird.f32 %v807_v3 }
 0x5b7   :  { %1374 = vperm.xlu1 %1955, %v1356_v21  }
 0x5b8   :  { %v1974_v53 = vpop.eup %1973 }
 0x5b9   :  { %v812_v61 = vmul.f32 %v1974_v53, %v807_v3  ;;  %vm818_vm14 = vweird.f32 %v1974_v53 }
 0x5ba   :  { %vm819_vm3 = vmor %vm817_vm15, %vm818_vm14 }
 0x5bb   :  { %v813_v11 = vmul.f32 %v1974_v53, %v812_v61  ;;  %v1627_v61 = vld [vmem:[%s2745_s17 + $0x8] sm:$0xff] }
 0x5bd   :  { %v814_v0 = vmul.f32 0.5, %v813_v11  ;;  %v1628_v11 = vld [vmem:[%s2745_s17 + $0x10] sm:$0xff] }
 0x5bf   :  { %1510 = vperm.xlu1 %1955, %v1500_v19   ;;  %v815_v21 = vsub.f32 1.5, %v814_v0  ;;  %v1630_v0 = vld [vmem:[%s2745_s17 + $0x20] sm:$0xff] }
 0x5d7   :  { %v771_v14 = vpop.xlane.xlu1 %770 }
 0x5d8   :  { %v784_v24 = vmul.f32 %v2501_v33, %v771_v14 }
 0x5da   :  { %v2551_v35 = vsub.f32 %v2493_v58, %v784_v24  ;;  %v793_v58 = vmul.f32 %v2557_v37, %v2557_v37 }
 0x5dc   :  { %v792_v36 = vmul.f32 %v2551_v35, %v2551_v35 }
 0x5de   :  { %797 = vadd.xlane.f32.xlu2 %v792_v36 }
 0x5e6   :  { %799 = vadd.xlane.f32.xlu2 %v793_v58 }
 0x5ee   :  { %801 = vadd.xlane.f32.xlu2 %v794_v63 }
 0x606   :  { %861 = vperm.xlu2 %1954, %v855_v7  }
 0x609   :  { %v867_v18 = vpop.permute.xlu1 %866 }
 0x60e   :  { %871 = vperm.xlu2 %1954, %v857_v17  }
 0x60f   :  { %v1246_v34 = vpop.f32.mrf.mxu0 }
 0x611   :  { %v895_v8 = vpop.permute.xlu1 %894 }
 0x614   :  { %v1186_v26 = vpop.f32.mrf.mxu3  ;;  %v1206_v30 = vpop.f32.mrf.mxu2 }
 0x616   :  { %889 = vperm.xlu2 %1954, %v883_v23  }
 0x617   :  { %v1306_v40 = vpop.f32.mrf.mxu0 }
 0x619   :  { %v905_v44 = vpop.permute.xlu1 %904 }
 0x61c   :  { %v1226_v32 = vpop.f32.mrf.mxu3  ;;  %v1266_v12 = vpop.f32.mrf.mxu2 }
 0x61e   :  { %899 = vperm.xlu2 %1954, %v885_v31  }
 0x61f   :  { %v1591_v42 = vpop.f32.mrf.mxu0 }
 0x620   :  { %v1592_v43 = vadd.f32 %v1963_v41, %v1591_v42 }
 0x622   :  { %v1594_v46 = vmax.f32 %v1592_v43, 0.0 }
 0x624   :  { %v1286_v13 = vpop.f32.mrf.mxu3  ;;  %v1326_v27 = vpop.f32.mrf.mxu2  ;;  %1890 = vmatmul.msk.f32.vlgmr.msra.gmra.mxu2 %vm412_vm12, %v1594_v46 }
 0x626   :  { %1359 = vperm.xlu2 %1954, %v1353_v9   ;;  %v816_v9 = vmul.f32 %v1974_v53, %v815_v21 }
 0x62c   :  { %v1346_v39 = vpop.f32.mrf.mxu3 }
 0x62d   :  { %1397 = vmatpush.msrb.mxu1 %v1346_v39 }
 0x62e   :  { %1369 = vperm.xlu2 %1954, %v1355_v25   ;;  %v1499_v25 = vld [vmem:[%s2743_s14] sm:$0xff] }
 0x62f   :  { %1398 = vmatpush.msrb.mxu1 %v1326_v27  ;;  %1505 = vperm.xlu0 %1956, %v1499_v25  }
 0x631   :  { %1399 = vmatpush.msrb.mxu1 %v1306_v40  ;;  %v820_v40 = vsel %vm819_vm3, %v1974_v53, %v816_v9 }
 0x632   :  { %v851_v1 = vmul.f32 %v820_v40, %v2504_v15 }
 0x633   :  { %1400 = vmatpush.msrb.mxu1 %v1286_v13 }
 0x635   :  { %1401 = vmatpush.msrb.mxu1 %v1266_v12 }
 0x637   :  { %1402 = vmatpush.msrb.mxu1 %v1246_v34 }
 0x639   :  { %1403 = vmatpush.msrb.mxu1 %v1226_v32 }
 0x63b   :  { %1404 = vmatpush.msrb.mxu1 %v1206_v30 }
 0x63d   :  { %1405 = vmatpush.msrb.mxu1 %v1186_v26 }
 0x63e   :  { %1885 = vmatmul.msk.f32.vlgmr.msrb.gmra.mxu1 %vm1377_vm2, %v1349_v28 }
 0x646   :  { %1886 = vmatmul.msk.f32.gmra.mxu1 %vm1377_vm2, %v1350_v45 }
 0x64e   :  { %1887 = vmatmul.msk.f32.gmra.mxu1 %vm1377_vm2, %v1351_v48 }
 0x651   :  { %v798_v4 = vpop.xlane.xlu2 %797 }
 0x652   :  { %v804_v49 = vmul.f32 %v798_v4, %v2501_v33  ;;  %v1365_v4 = vpop.permute.xlu1 %1364 }
 0x654   :  { %v808_v51 = vadd.f32 1e-05, %v804_v49 }
 0x656   :  { %1975 = vrsqrt.f32 %v808_v51  ;;  %1888 = vmatmul.msk.f32.gmra.mxu1 %vm1377_vm2, %v1352_v50  ;;  %vm827_vm9 = vweird.f32 %v808_v51 }
 0x659   :  { %v800_v52 = vpop.xlane.xlu2 %799 }
 0x65a   :  { %v805_v57 = vmul.f32 %v800_v52, %v2501_v33 }
 0x65c   :  { %v1976_v54 = vpop.eup %1975  ;;  %v809_v59 = vadd.f32 1e-05, %v805_v57  ;;  %v1626_v57 = vld [vmem:[%s2745_s17] sm:$0xff] }
 0x65d   :  { %v822_v60 = vmul.f32 %v1976_v54, %v808_v51  ;;  %vm828_vm8 = vweird.f32 %v1976_v54 }
 0x65e   :  { %1977 = vrsqrt.f32 %v809_v59  ;;  %vm829_vm10 = vmor %vm827_vm9, %vm828_vm8  ;;  %vm837_vm12 = vweird.f32 %v809_v59 }
 0x65f   :  { %v823_v55 = vmul.f32 %v1976_v54, %v822_v60  ;;  %v1631_v60 = vld [vmem:[%s2745_s17 + $0x28] sm:$0xff] }
 0x661   :  { %v824_v20 = vmul.f32 0.5, %v823_v55  ;;  %v802_v22 = vpop.xlane.xlu2 %801  ;;  %v1375_v55 = vpop.permute.xlu1 %1374 }
 0x662   :  { %v806_v10 = vmul.f32 %v802_v22, %v2501_v33  ;;  %v1632_v22 = vld [vmem:[%s2745_s17 + $0x30] sm:$0xff] }
 0x663   :  { %v825_v14 = vsub.f32 1.5, %v824_v20 }
 0x664   :  { %v1978_v24 = vpop.eup %1977  ;;  %v810_v16 = vadd.f32 1e-05, %v806_v10  ;;  %v1502_v10 = vld [vmem:[%s2743_s14 + $0x18] sm:$0xff] }
 0x665   :  { %v832_v36 = vmul.f32 %v1978_v24, %v809_v59  ;;  %v826_v38 = vmul.f32 %v1976_v54, %v825_v14  ;;  %vm838_vm11 = vweird.f32 %v1978_v24  ;;  %v1633_v14 = vld [vmem:[%s2745_s17 + $0x38] sm:$0xff] }
 0x666   :  { %1979 = vrsqrt.f32 %v810_v16  ;;  %vm839_vm13 = vmor %vm837_vm12, %vm838_vm11  ;;  %vm847_vm5 = vweird.f32 %v810_v16 }
 0x667   :  { %v833_v58 = vmul.f32 %v1978_v24, %v832_v36  ;;  %v830_v56 = vsel %vm829_vm10, %v1976_v54, %v826_v38  ;;  %v1527_v36 = vld [vmem:[%s2746_s24] sm:$0xff] }
 0x668   :  { %v852_v62 = vmul.f32 %v830_v56, %v2551_v35  ;;  %v1634_v38 = vld [vmem:[%s2745_s17 + $0x40] sm:$0xff]  ;;  %v1635_v56 = vld [vmem:[%s2745_s17 + $0x48] sm:$0xff] }
 0x669   :  { %v834_v63 = vmul.f32 0.5, %v833_v58  ;;  %v862_v7 = vpop.permute.xlu2 %861  ;;  %v1501_v58 = vld [vmem:[%s2743_s14 + $0x10] sm:$0xff] }
 0x66a   :  { %v880_v17 = vmul.f32 %v867_v18, %v852_v62  ;;  %v879_v42 = vmul.f32 %v862_v7, %v851_v1  ;;  %v1636_v62 = vld [vmem:[%s2745_s17 + $0x50] sm:$0xff]  ;;  %v1638_v7 = vld [vmem:[%s2745_s17 + $0x60] sm:$0xff] }
 0x66b   :  { %v835_v23 = vsub.f32 1.5, %v834_v63  ;;  %v1637_v63 = vld [vmem:[%s2745_s17 + $0x58] sm:$0xff] }
 0x66c   :  { %v1980_v26 = vpop.eup %1979  ;;  %v2597_v19 = vadd.f32 %v895_v8, %v880_v17  ;;  %v1639_v8 = vld [vmem:[%s2745_s17 + $0x68] sm:$0xff] }
 0x66d   :  { %v842_v30 = vmul.f32 %v1980_v26, %v810_v16  ;;  %v836_v31 = vmul.f32 %v1978_v24, %v835_v23  ;;  %vm848_vm4 = vweird.f32 %v1980_v26  ;;  %v1629_v16 = vld [vmem:[%s2745_s17 + $0x18] sm:$0xff] }
 0x66e   :  { %vm849_vm6 = vmor %vm847_vm5, %vm848_vm4 }
 0x66f   :  { %v843_v32 = vmul.f32 %v1980_v26, %v842_v30  ;;  %v840_v12 = vsel %vm839_vm13, %v1978_v24, %v836_v31  ;;  %v1528_v24 = vld [vmem:[%s2746_s24 + $0x8] sm:$0xff]  ;;  %v1640_v30 = vld [vmem:[%s2745_s17 + $0x70] sm:$0xff] }
 0x670   :  { %v853_v35 = vmul.f32 %v840_v12, %v2557_v37 }
 0x671   :  { %v844_v13 = vmul.f32 0.5, %v843_v32  ;;  %v872_v34 = vpop.permute.xlu2 %871  ;;  %v2657_v32 = vpop.permute.xlu1 %1510 }
 0x672   :  { %v881_v39 = vmul.f32 %v872_v34, %v853_v35  ;;  %v1641_v35 = vld [vmem:[%s2745_s17 + $0x78] sm:$0xff] }
 0x673   :  { %v845_v27 = vsub.f32 1.5, %v844_v13 }
 0x675   :  { %v846_v28 = vmul.f32 %v1980_v26, %v845_v27 }
 0x677   :  { %v850_v41 = vsel %vm849_vm6, %v1980_v26, %v846_v28  ;;  %vm912_vm6 = vcmp.gt.f32.partialorder %v2597_v19, 0.0 }
 0x678   :  { %v854_v37 = vmul.f32 %v850_v41, %v2565_v6  ;;  %v1964_v6 = vld [vmem:[%s2199_s6] ss:$0 sm:$0xff] }
 0x679   :  { %v890_v43 = vpop.permute.xlu2 %889 }
 0x67a   :  { %v2603_v45 = vadd.f32 %v890_v43, %v879_v42  ;;  %v882_v46 = vmul.f32 %v877_v29, %v854_v37  ;;  %v1530_v42 = vld [vmem:[%s2746_s24 + $0x18] sm:$0xff]  ;;  %v1529_v43 = vld [vmem:[%s2746_s24 + $0x10] sm:$0xff] }
 0x67c   :  { %v2605_v47 = vadd.f32 %v905_v44, %v882_v46  ;;  %vm911_vm14 = vcmp.gt.f32.partialorder %v2603_v45, 0.0 }
 0x681   :  { %v900_v5 = vpop.permute.xlu2 %899 }
 0x682   :  { %v2607_v48 = vadd.f32 %v900_v5, %v881_v39 }
 0x689   :  { %v1360_v2 = vpop.permute.xlu2 %1359 }
 0x691   :  { %v1370_v53 = vpop.permute.xlu2 %1369 }
 0x6a1   :  { %v2648_v17 = vpop.permute.xlu0 %1505 }
 0x6a7   :  { %v1623_v51 = vpop.f32.mrf.mxu2 }
 0x6a8   :  { %v1624_v52 = vadd.f32 %v1964_v6, %v1623_v51 }
 0x6aa   :  { %1891 = vmatpush.msk.msrb.mxu0 %vm156_vm0, %v1624_v52  ;;  %1916 = vmatpush.msk.msrb.mxu2 %vm156_vm0, %v1624_v52 }
 0x6ab   :  { %1892 = vmatmul.msk.f32.vlgmr.msrb.gmra.mxu0 %vm143_vm1, %v1626_v57  ;;  %1917 = vmatpush.msk.msrb.mxu3 %vm156_vm0, %v1624_v52 }
 0x6ac   :  { %1897 = vmatmul.msk.f32.vlgmr.msrb.gmra.mxu2 %vm143_vm1, %v1631_v60  ;;  %1902 = vmatmul.msk.f32.vlgmr.msrb.gmra.mxu3 %vm143_vm1, %v1636_v62 }
 0x6b3   :  { %1893 = vmatmul.msk.f32.gmra.mxu0 %vm143_vm1, %v1627_v61 }
 0x6b4   :  { %1898 = vmatmul.msk.f32.gmra.mxu2 %vm143_vm1, %v1632_v22  ;;  %1903 = vmatmul.msk.f32.gmra.mxu3 %vm143_vm1, %v1637_v63 }
 0x6bb   :  { %v1407_v15 = vpop.f32.mrf.mxu1  ;;  %1894 = vmatmul.msk.f32.gmra.mxu0 %vm143_vm1, %v1628_v11 }
 0x6bc   :  { %v1408_v3 = vadd.f32 %v1407_v15, %v1360_v2  ;;  %1899 = vmatmul.msk.f32.gmra.mxu2 %vm143_vm1, %v1633_v14  ;;  %1904 = vmatmul.msk.f32.gmra.mxu3 %vm143_vm1, %v1638_v7 }
 0x6be   :  { %1419 = vadd.xlane.f32.xlu2 %v1408_v3 }
 0x6c3   :  { %v1410_v49 = vpop.f32.mrf.mxu1  ;;  %1895 = vmatmul.msk.f32.gmra.mxu0 %vm143_vm1, %v1629_v16 }
 0x6c4   :  { %v2609_v50 = vadd.f32 %v1410_v49, %v1365_v4  ;;  %1900 = vmatmul.msk.f32.gmra.mxu2 %vm143_vm1, %v1634_v38  ;;  %1905 = vmatmul.msk.f32.gmra.mxu3 %vm143_vm1, %v1639_v8 }
 0x6c6   :  { %1421 = vadd.xlane.f32.xlu0 %v2609_v50 }
 0x6cb   :  { %v1413_v54 = vpop.f32.mrf.mxu1  ;;  %1896 = vmatmul.msk.f32.gmra.mxu0 %vm143_vm1, %v1630_v0 }
 0x6cc   :  { %v1414_v59 = vadd.f32 %v1413_v54, %v1370_v53  ;;  %1901 = vmatmul.msk.f32.gmra.mxu2 %vm143_vm1, %v1635_v56  ;;  %1906 = vmatmul.msk.f32.gmra.mxu3 %vm143_vm1, %v1640_v30 }
 0x6ce   :  { %1423 = vadd.xlane.f32.xlu1 %v1414_v59 }
 0x6d3   :  { %v1416_v18 = vpop.f32.mrf.mxu1 }
 0x6d4   :  { %v1417_v20 = vadd.f32 %v1416_v18, %v1375_v55  ;;  %1907 = vmatmul.msk.f32.gmra.mxu3 %vm143_vm1, %v1641_v35 }
 0x6d6   :  { %1425 = vadd.xlane.f32.xlu2 %v1417_v20 }
 0x6da   :  { %1520 = vperm.xlu0 %1956, %v1502_v10  }
 0x6e2   :  { %1538 = vperm.xlu0 %1956, %v1528_v24  }
 0x6e7   :  { %1533 = vperm.xlu1 %1955, %v1527_v36  }
 0x6ee   :  { %1515 = vperm.xlu2 %1954, %v1501_v58  }
 0x728   :  { %v1710_v37 = vpop.f32.mrf.mxu0 }
 0x72f   :  { %v1725_v15 = vpop.f32.mrf.mxu2 }
 0x730   :  { %v1713_v44 = vpop.f32.mrf.mxu0 }
 0x731   :  { %v1420_v21 = vpop.xlane.xlu2 %1419 }
 0x732   :  { %v1427_v23 = vmul.f32 %v1420_v21, %v2501_v33 }
 0x734   :  { %v2651_v26 = vsub.f32 %v1408_v3, %v1427_v23 }
 0x736   :  { %v1435_v31 = vmul.f32 %v2651_v26, %v2651_v26 }
 0x737   :  { %v1728_v3 = vpop.f32.mrf.mxu2 }
 0x738   :  { %1439 = vadd.xlane.f32.xlu2 %v1435_v31  ;;  %v1716_v46 = vpop.f32.mrf.mxu0 }
 0x739   :  { %v1422_v9 = vpop.xlane.xlu0 %1421 }
 0x73a   :  { %v1428_v12 = vmul.f32 %v1422_v9, %v2501_v33 }
 0x73c   :  { %v2662_v13 = vsub.f32 %v2609_v50, %v1428_v12  ;;  %v1740_v50 = vpop.f32.mrf.mxu3 }
 0x73e   :  { %v1436_v34 = vmul.f32 %v2662_v13, %v2662_v13 }
 0x73f   :  { %v1731_v4 = vpop.f32.mrf.mxu2 }
 0x740   :  { %1441 = vadd.xlane.f32.xlu0 %v1436_v34  ;;  %v1719_v5 = vpop.f32.mrf.mxu0 }
 0x741   :  { %v1424_v25 = vpop.xlane.xlu1 %1423 }
 0x742   :  { %v1429_v39 = vmul.f32 %v1424_v25, %v2501_v33 }
 0x744   :  { %v2668_v27 = vsub.f32 %v1414_v59, %v1429_v39  ;;  %v1743_v51 = vpop.f32.mrf.mxu3 }
 0x746   :  { %v1437_v40 = vmul.f32 %v2668_v27, %v2668_v27 }
 0x747   :  { %v1734_v49 = vpop.f32.mrf.mxu2 }
 0x748   :  { %1443 = vadd.xlane.f32.xlu1 %v1437_v40  ;;  %v1722_v2 = vpop.f32.mrf.mxu0 }
 0x749   :  { %v1426_v28 = vpop.xlane.xlu2 %1425 }
 0x74a   :  { %v1430_v1 = vmul.f32 %v1426_v28, %v2501_v33 }
 0x74c   :  { %v2673_v41 = vsub.f32 %v1417_v20, %v1430_v1  ;;  %v1746_v52 = vpop.f32.mrf.mxu3  ;;  %v2679_v57 = vpop.permute.xlu0 %1520 }
 0x74e   :  { %v1438_v29 = vmul.f32 %v2673_v41, %v2673_v41 }
 0x74f   :  { %v1737_v6 = vpop.f32.mrf.mxu2 }
 0x750   :  { %1445 = vadd.xlane.f32.xlu2 %v1438_v29 }
 0x751   :  { %v2681_v53 = vpop.permute.xlu2 %1515 }
 0x754   :  { %v1749_v54 = vpop.f32.mrf.mxu3  ;;  %v2683_v59 = vpop.permute.xlu0 %1538 }
 0x759   :  { %v1534_v20 = vpop.permute.xlu1 %1533 }
 0x75c   :  { %v1752_v61 = vpop.f32.mrf.mxu3 }
 0x761   :  { %1548 = vperm.xlu1 %1955, %v1530_v42  }
 0x764   :  { %v1755_v11 = vpop.f32.mrf.mxu3 }
 0x768   :  { %1543 = vperm.xlu2 %1954, %v1529_v43  }
 0x769   :  { %1758 = vxpose.xlu0.b32.start [1/16] (narrow) %v1710_v37, 32 }
 0x771   :  { %1759 = vxpose.xlu0.b32.cont [2/16] (narrow) %v1713_v44, 32 }
 0x779   :  { %1760 = vxpose.xlu0.b32.cont [3/16] (narrow) %v1716_v46, 32 }
 0x781   :  { %1761 = vxpose.xlu0.b32.cont [4/16] (narrow) %v1719_v5, 32 }
 0x789   :  { %1762 = vxpose.xlu0.b32.cont [5/16] (narrow) %v1722_v2, 32 }
 0x791   :  { %1763 = vxpose.xlu0.b32.cont [6/16] (narrow) %v1725_v15, 32 }
 0x799   :  { %1764 = vxpose.xlu0.b32.cont [7/16] (narrow) %v1728_v3, 32 }
 0x7a1   :  { %1765 = vxpose.xlu0.b32.cont [8/16] (narrow) %v1731_v4, 32 }
 0x7a9   :  { %1766 = vxpose.xlu0.b32.cont [9/16] (narrow) %v1734_v49, 32 }
 0x7ab   :  { %v1440_v60 = vpop.xlane.xlu2 %1439 }
 0x7ac   :  { %v1447_v55 = vmul.f32 %v1440_v60, %v2501_v33 }
 0x7ae   :  { %v1451_v18 = vadd.f32 1e-05, %v1447_v55 }
 0x7b0   :  { %1981 = vrsqrt.f32 %v1451_v18  ;;  %vm1461_vm1 = vweird.f32 %v1451_v18 }
 0x7b1   :  { %1767 = vxpose.xlu0.b32.cont [10/16] (narrow) %v1737_v6, 32 }
 0x7b3   :  { %v1442_v22 = vpop.xlane.xlu0 %1441 }
 0x7b4   :  { %v1448_v10 = vmul.f32 %v1442_v22, %v2501_v33 }
 0x7b6   :  { %v1452_v14 = vadd.f32 1e-05, %v1448_v10  ;;  %v1982_v16 = vpop.eup %1981 }
 0x7b7   :  { %v1456_v38 = vmul.f32 %v1982_v16, %v1451_v18  ;;  %vm1462_vm0 = vweird.f32 %v1982_v16 }
 0x7b8   :  { %1983 = vrsqrt.f32 %v1452_v14  ;;  %vm1463_vm7 = vmor %vm1461_vm1, %vm1462_vm0  ;;  %vm1471_vm8 = vweird.f32 %v1452_v14  ;;  %vm913_vm1 = vcmp.gt.f32.partialorder %v2607_v48, 0.0 }
 0x7b9   :  { %1768 = vxpose.xlu0.b32.cont [11/16] (narrow) %v1740_v50, 32  ;;  %v1457_v58 = vmul.f32 %v1982_v16, %v1456_v38  ;;  %v915_v50 = vmul.f32 0.1, %v2603_v45 }
 0x7bb   :  { %v1444_v24 = vpop.xlane.xlu1 %1443  ;;  %v1458_v7 = vmul.f32 0.5, %v1457_v58  ;;  %v919_v60 = vsel %vm911_vm14, %v2603_v45, %v915_v50 }
 0x7bc   :  { %v1449_v36 = vmul.f32 %v1444_v24, %v2501_v33 }
 0x7bd   :  { %v1459_v23 = vsub.f32 1.5, %v1458_v7 }
 0x7be   :  { %v1453_v0 = vadd.f32 1e-05, %v1449_v36  ;;  %v1984_v62 = vpop.eup %1983  ;;  %v917_v36 = vmul.f32 0.1, %v2607_v48 }
 0x7bf   :  { %v1466_v8 = vmul.f32 %v1984_v62, %v1452_v14  ;;  %v1460_v9 = vmul.f32 %v1982_v16, %v1459_v23  ;;  %vm1472_vm2 = vweird.f32 %v1984_v62 }
 0x7c0   :  { %1985 = vrsqrt.f32 %v1453_v0  ;;  %vm1473_vm9 = vmor %vm1471_vm8, %vm1472_vm2  ;;  %vm1481_vm11 = vweird.f32 %v1453_v0  ;;  %vm914_vm2 = vcmp.gt.f32.partialorder %v2605_v47, 0.0 }
 0x7c1   :  { %1769 = vxpose.xlu0.b32.cont [12/16] (narrow) %v1743_v51, 32  ;;  %v1467_v30 = vmul.f32 %v1984_v62, %v1466_v8  ;;  %v1464_v34 = vsel %vm1463_vm7, %v1982_v16, %v1460_v9 }
 0x7c2   :  { %v1495_v28 = vmul.f32 %v1464_v34, %v2651_v26 }
 0x7c3   :  { %v1446_v56 = vpop.xlane.xlu2 %1445  ;;  %v1468_v12 = vmul.f32 0.5, %v1467_v30 }
 0x7c4   :  { %v1450_v63 = vmul.f32 %v1446_v56, %v2501_v33  ;;  %v1523_v42 = vmul.f32 %v2648_v17, %v1495_v28 }
 0x7c5   :  { %v1469_v25 = vsub.f32 1.5, %v1468_v12 }
 0x7c6   :  { %v1454_v21 = vadd.f32 1e-05, %v1450_v63  ;;  %v1986_v31 = vpop.eup %1985  ;;  %v1551_v5 = vadd.f32 %v1534_v20, %v1523_v42 }
 0x7c7   :  { %v1476_v35 = vmul.f32 %v1986_v31, %v1453_v0  ;;  %v1470_v33 = vmul.f32 %v1984_v62, %v1469_v25  ;;  %vm1482_vm10 = vweird.f32 %v1986_v31 }
 0x7c8   :  { %1987 = vrsqrt.f32 %v1454_v21  ;;  %vm1483_vm12 = vmor %vm1481_vm11, %vm1482_vm10  ;;  %v1559_v26 = vmul.f32 0.1, %v1551_v5  ;;  %vm1555_vm13 = vcmp.gt.f32.partialorder %v1551_v5, 0.0  ;;  %vm1491_vm3 = vweird.f32 %v1454_v21 }
 0x7c9   :  { %1770 = vxpose.xlu0.b32.cont [13/16] (narrow) %v1746_v52, 32  ;;  %v1477_v39 = vmul.f32 %v1986_v31, %v1476_v35  ;;  %v1474_v37 = vsel %vm1473_vm9, %v1984_v62, %v1470_v33  ;;  %v921_v62 = vsel %vm913_vm1, %v2607_v48, %v917_v36 }
 0x7ca   :  { %v1496_v46 = vmul.f32 %v1474_v37, %v2662_v13  ;;  %v1563_v13 = vsel %vm1555_vm13, %v1551_v5, %v1559_v26 }
 0x7cb   :  { %v1478_v1 = vmul.f32 0.5, %v1477_v39 }
 0x7cc   :  { %v1524_v3 = vmul.f32 %v2657_v32, %v1496_v46 }
 0x7cd   :  { %v1479_v43 = vsub.f32 1.5, %v1478_v1 }
 0x7ce   :  { %v1988_v40 = vpop.eup %1987  ;;  %v1552_v51 = vadd.f32 %v2683_v59, %v1524_v3  ;;  %v1544_v59 = vpop.permute.xlu2 %1543 }
 0x7cf   :  { %v1486_v29 = vmul.f32 %v1988_v40, %v1454_v21  ;;  %v1480_v15 = vmul.f32 %v1986_v31, %v1479_v43  ;;  %vm1492_vm15 = vweird.f32 %v1988_v40 }
 0x7d0   :  { %vm1493_vm4 = vmor %vm1491_vm3, %vm1492_vm15  ;;  %v1560_v55 = vmul.f32 0.1, %v1552_v51  ;;  %vm1556_vm5 = vcmp.gt.f32.partialorder %v1552_v51, 0.0 }
 0x7d1   :  { %1771 = vxpose.xlu0.b32.cont [14/16] (narrow) %v1749_v54, 32  ;;  %v1487_v44 = vmul.f32 %v1988_v40, %v1486_v29  ;;  %v1484_v49 = vsel %vm1483_vm12, %v1986_v31, %v1480_v15 }
 0x7d2   :  { %v1497_v17 = vmul.f32 %v1484_v49, %v2668_v27  ;;  %v916_v27 = vmul.f32 0.1, %v2597_v19  ;;  %v1564_v10 = vsel %vm1556_vm5, %v1552_v51, %v1560_v55 }
 0x7d3   :  { %v1488_v2 = vmul.f32 0.5, %v1487_v44  ;;  %v1549_v38 = vpop.permute.xlu1 %1548 }
 0x7d4   :  { %v920_v14 = vsel %vm912_vm6, %v2597_v19, %v916_v27 }
 0x7d5   :  { %v1489_v4 = vsub.f32 1.5, %v1488_v2 }
 0x7d7   :  { %v1490_v52 = vmul.f32 %v1988_v40, %v1489_v4 }
 0x7d9   :  { %1772 = vxpose.xlu0.b32.cont [15/16] (narrow) %v1752_v61, 32  ;;  %v1525_v61 = vmul.f32 %v2681_v53, %v1497_v17  ;;  %v1494_v18 = vsel %vm1493_vm4, %v1988_v40, %v1490_v52 }
 0x7da   :  { %v1498_v22 = vmul.f32 %v1494_v18, %v2673_v41 }
 0x7db   :  { %v1553_v20 = vadd.f32 %v1544_v59, %v1525_v61 }
 0x7dc   :  { %v1526_v16 = vmul.f32 %v2679_v57, %v1498_v22  ;;  %v918_v57 = vmul.f32 0.1, %v2605_v47 }
 0x7dd   :  { %v1561_v24 = vmul.f32 0.1, %v1553_v20  ;;  %vm1557_vm0 = vcmp.gt.f32.partialorder %v1553_v20, 0.0 }
 0x7de   :  { %v1554_v0 = vadd.f32 %v1549_v38, %v1526_v16  ;;  %v922_v23 = vsel %vm914_vm2, %v2605_v47, %v918_v57 }
 0x7df   :  { %v1565_v41 = vsel %vm1557_vm0, %v1553_v20, %v1561_v24 }
 0x7e0   :  { %v1562_v63 = vmul.f32 0.1, %v1554_v0  ;;  %vm1558_vm7 = vcmp.gt.f32.partialorder %v1554_v0, 0.0 }
 0x7e1   :  { %1773 = vxpose.xlu0.b32.end [16/16] (narrow) %v1755_v11, 32 }
 0x7e2   :  { %v1566_v7 = vsel %vm1558_vm7, %v1554_v0, %v1562_v63 }
 0x80d   :  { %v1774_v6 = vpop.trf.xlu0 }
 0x80e   :  { %v1790_v54 = vmul.f32 %v1774_v6, %v1563_v13 }
 0x810   :  { %v1794_v32 = vadd.f32 %v1790_v54, %v919_v60 }
 0x812   :  { %1798 = vst [vmem:[%s2204_s27] sm:$0xff] %v1794_v32 }
 0x815   :  { %v1775_v45 = vpop.trf.xlu0 }
 0x816   :  { %v1791_v11 = vmul.f32 %v1775_v45, %v1564_v10 }
 0x818   :  { %v1795_v53 = vadd.f32 %v1791_v11, %v920_v14 }
 0x81a   :  { %1799 = vst [vmem:[%s2204_s27 + $0x8] sm:$0xff] %v1795_v53 }
 0x81d   :  { %v1776_v58 = vpop.trf.xlu0 }
 0x81e   :  { %v1792_v56 = vmul.f32 %v1776_v58, %v1565_v41 }
 0x820   :  { %v1796_v19 = vadd.f32 %v1792_v56, %v921_v62 }
 0x822   :  { %1800 = vst [vmem:[%s2204_s27 + $0x10] sm:$0xff] %v1796_v19 }
 0x825   :  { %v1777_v8 = vpop.trf.xlu0 }
 0x826   :  { %v1793_v21 = vmul.f32 %v1777_v8, %v1566_v7 }
 0x828   :  { %v1797_v30 = vadd.f32 %v1793_v21, %v922_v23 }
 0x82a   :  { %1801 = vst [vmem:[%s2204_s27 + $0x18] sm:$0xff] %v1797_v30 }
 0x82b   :  { %1806 = vsyncpa [#allocation3], 1 }

</bundles_post_ra>
